<compile_context>
chip_gen: v7x
topology: tpu7x:2x2x1
jax: 0.10.0
libtpu: 0.0.40
codegen_flags: <defaults>
</compile_context>

<pallas_src>
import functools
import math

import jax
import jax.numpy as jnp
from jax.experimental import pallas as pl
from jax.experimental.pallas import tpu as pltpu


# --------------------------------------------------------------------------
# Small helpers
# --------------------------------------------------------------------------

_MM_DTYPE = jnp.bfloat16  # MXU input dtype (v6e/v7x bf16 path); accumulation stays f32


def _mm(a, b):
    """MXU matmul with bf16 inputs and f32 accumulation."""
    return jnp.dot(a.astype(_MM_DTYPE), b.astype(_MM_DTYPE),
                   preferred_element_type=jnp.float32)


def _vmem():
    return pl.BlockSpec(memory_space=pltpu.MemorySpace.VMEM)


def _smem():
    return pl.BlockSpec(memory_space=pltpu.MemorySpace.SMEM)


# --------------------------------------------------------------------------
# Pallas kernels
# --------------------------------------------------------------------------

def _aug_path_kernel(xt_ref, an_ref,
                     fpw_ref, fpb_ref,
                     w1_ref, b1_ref, w2_ref, b2_ref, w3_ref, b3_ref,
                     e1p_ref, e1g_ref, e1c_ref,
                     xproj_ref, pc_ref):
    """TemporalMSCIA.feature_proj + aug_gnn (no node types) + factorized edge-MLP L1.

    Outputs:
      xproj_ref : X_proj = relu(X_time @ fp_w + fp_b)                      [n, H]
      pc_ref    : Pc = H_v @ W1_pair + 0.5*(h_G @ W1_graph + W1_const+b1)  [n, H//2]
                  so that edge hidden(i,j) = relu(Pc[i] + Pc[j]).
    """
    # feature projection (BN folded, dropout = eval identity)
    xp = jnp.maximum(_mm(xt_ref[...], fpw_ref[...]) + fpb_ref[...], 0.0)
    xproj_ref[...] = xp

    # aug_gnn forward (GNNEncoder, node_types=None); an_ref is clip(A,0,1)/rowsum
    x = jnp.clip(xp, -10.0, 10.0)
    h = jnp.maximum(_mm(x, w1_ref[...]) + b1_ref[...], 0.0)
    m = jnp.maximum(_mm(h, w2_ref[...]) + b2_ref[...], 0.0)
    z = h + _mm(an_ref[...], m)
    hv = jnp.tanh(_mm(z, w3_ref[...]) + b3_ref[...])
    n = hv.shape[0]
    hg = jnp.sum(hv, axis=0, keepdims=True) * (1.0 / n)   # h_G = mean over nodes

    # factorized first edge-MLP layer
    c = _mm(hg, e1g_ref[...]) + e1c_ref[...]               # [1, H//2]
    pc_ref[...] = _mm(hv, e1p_ref[...]) + 0.5 * c          # [n, H//2]


def _pair_score_kernel(pc_ref, pct_ref, w2_ref, b2_ref, s_ref):
    """Pairwise edge scores: s[i,j] = tanh( relu(Pc[i]+Pc[j]) . w2 + b2 ).

    Lane-dense [n, n] output; the reduction over the (small) factor dim is an
    unrolled loop of 2-D broadcast adds ([n,1] + [1,n]) scaled by SMEM scalars.
    """
    hh = pc_ref.shape[1]
    acc = jnp.zeros(s_ref.shape, jnp.float32)
    for h in range(hh):
        col = pc_ref[:, h:h + 1]          # [n, 1]
        row = pct_ref[h:h + 1, :]         # [1, n]
        acc = acc + jnp.maximum(col + row, 0.0) * w2_ref[h]
    s_ref[...] = jnp.tanh(acc + b2_ref[0])


def _encoder_kernel(an_ref, x_ref, t_ref,
                    w1_ref, b1_ref, w2_ref, b2_ref, w3_ref, b3_ref,
                    z_ref):
    """Encoder GNN (with node-type embedding add). Batched over grid=(3,):
    (A, X_proj), (A_aug, X_proj), (A, X_neg); weights/types stay VMEM-resident."""
    x = jnp.clip(x_ref[...], -10.0, 10.0)
    h = jnp.maximum(_mm(x, w1_ref[...]) + b1_ref[...], 0.0) + t_ref[...]
    m = jnp.maximum(_mm(h, w2_ref[...]) + b2_ref[...], 0.0)
    z = h + _mm(an_ref[...], m)
    z_ref[...] = jnp.tanh(_mm(z, w3_ref[...]) + b3_ref[...])


def _post_kernel(xproj_ref, zo_ref, za_ref, ac_ref, zoc_ref, zac_ref,
                 pw1_ref, pb1_ref, pw2_ref, pb2_ref,
                 ow_ref, ob_ref,
                 xp_ref, out_ref, so_ref, sa_ref):
    """proj_head(X_proj) + output_proj(Z_orig) + centers-only subgraph summaries."""
    # proj_head on clamped X_proj (the X_neg path is a row permutation of this output)
    xc = jnp.clip(xproj_ref[...], -10.0, 10.0)
    ph = jnp.maximum(_mm(xc, pw1_ref[...]) + pb1_ref[...], 0.0)
    xp_ref[...] = jnp.tanh(_mm(ph, pw2_ref[...]) + pb2_ref[...])

    # TemporalMSCIA.output_proj on (unclamped) Z_orig
    out_ref[...] = jnp.tanh(_mm(zo_ref[...], ow_ref[...]) + ob_ref[...])

    # subgraph summaries computed only for the |C| center rows
    zo_cl = jnp.clip(zo_ref[...], -5.0, 5.0)
    za_cl = jnp.clip(za_ref[...], -5.0, 5.0)
    so_ref[...] = jnp.clip(zoc_ref[...], -5.0, 5.0) + 0.5 * _mm(ac_ref[...], zo_cl)
    sa_ref[...] = jnp.clip(zac_ref[...], -5.0, 5.0) + 0.5 * _mm(ac_ref[...], za_cl)


# --------------------------------------------------------------------------
# Plain-JAX glue (tiny reductions / losses; fused by XLA under jit)
# --------------------------------------------------------------------------

def l2norm(x, axis=-1):
    n = jnp.sqrt(jnp.sum(x * x, axis=axis, keepdims=True))
    return x / jnp.maximum(n, 1e-12)


def graph_contrastive_loss(Z_orig, Z_neg, tau):
    Zo = jnp.clip(Z_orig, -5.0, 5.0)
    Zn = jnp.clip(Z_neg, -5.0, 5.0)
    z_g = l2norm(jnp.mean(Zo, axis=0, keepdims=True))
    pos = jnp.clip(jnp.sum(l2norm(Zo) * z_g, axis=1) / tau, -10.0, 10.0)
    neg = jnp.clip(jnp.sum(l2norm(Zn) * z_g, axis=1) / tau, -10.0, 10.0)
    loss = (jnp.mean(jax.nn.softplus(-pos)) + jnp.mean(jax.nn.softplus(neg))) / 2.0
    return jnp.clip(loss, 0.0, 10.0)


def node_contrastive_loss_from_proj(Z, Xp, perm, tau):
    """Uses proj_head output Xp; X_neg_proj == Xp[perm] since proj_head is row-wise."""
    Zn = l2norm(jnp.clip(Z, -5.0, 5.0))
    Xp_n = l2norm(Xp)
    Xnp_n = Xp_n[perm]
    pos = jnp.clip(jnp.sum(Zn * Xp_n, axis=1) / tau, -10.0, 10.0)
    neg = jnp.clip(jnp.sum(Zn * Xnp_n, axis=1) / tau, -10.0, 10.0)
    loss = (jnp.mean(jax.nn.softplus(-pos)) + jnp.mean(jax.nn.softplus(neg))) / 2.0
    return jnp.clip(loss, 0.0, 10.0)


def subgraph_contrastive_loss_from_summaries(So, Sa, tau):
    So_n = l2norm(So)
    Sa_n = l2norm(Sa)
    logits = jnp.clip(So_n @ Sa_n.T / tau, -10.0, 10.0)
    lse = jax.nn.logsumexp(logits, axis=1)
    return jnp.mean(lse - jnp.diag(logits))


# --------------------------------------------------------------------------
# Parameter initialization (deterministic, BN folded into Linear)
# --------------------------------------------------------------------------

_BN_SCALE = 1.0 / math.sqrt(1.0 + 1e-5)  # eval-mode BN at init: (x-0)/sqrt(1+eps)


def init_params(key, input_dim, hidden, time_dim):
    keys = iter(jax.random.split(key, 32))

    def lin(fan_in, fan_out, bn):
        w = jax.random.normal(next(keys), (fan_in, fan_out), jnp.float32) * math.sqrt(2.0 / fan_in)
        b = jnp.zeros((1, fan_out), jnp.float32)
        if bn:
            w = w * _BN_SCALE
            b = b * _BN_SCALE
        return w, b

    def gnn(in_dim, h):
        w1, b1 = lin(in_dim, h, True)   # feature_proj (Linear+BN)
        w2, b2 = lin(h, h, True)        # message_proj (Linear+BN)
        w3, b3 = lin(h, h, True)        # output_proj (Linear+BN)
        return dict(w1=w1, b1=b1, w2=w2, b2=b2, w3=w3, b3=b3)

    p = {}
    p["time_emb"] = jax.random.normal(next(keys), (1000, time_dim), jnp.float32) * 0.01
    p["fp_w"], p["fp_b"] = lin(input_dim + time_dim, hidden, True)        # TemporalMSCIA.feature_proj
    p["aug_gnn"] = gnn(hidden, hidden)                                    # MSCIA.aug_gnn
    p["enc_gnn"] = gnn(hidden, hidden)                                    # MSCIA.encoder
    p["enc_type_emb"] = jax.random.normal(next(keys), (5, hidden // 4), jnp.float32) * 0.01
    ew1, eb1 = lin(2 * hidden + 1, hidden // 2, True)                     # edge_mlp layer 1
    ew2, eb2 = lin(hidden // 2, 1, False)                                 # edge_mlp layer 2
    p["edge_mlp"] = dict(w1=ew1, b1=eb1, w2=ew2, b2=eb2)
    pw1, pb1 = lin(hidden, hidden, True)                                  # proj_head layer 1
    pw2, pb2 = lin(hidden, hidden, False)                                 # proj_head layer 2
    p["proj_head"] = dict(w1=pw1, b1=pb1, w2=pw2, b2=pb2)
    p["out_w"], p["out_b"] = lin(hidden, hidden, True)                    # TemporalMSCIA.output_proj
    return p


# --------------------------------------------------------------------------
# Full forward (jittable: no host syncs)
# --------------------------------------------------------------------------

def temporal_mscia_forward(params, batch, rng, *, k_ratio, alpha, beta, gamma, tau):
    A = batch["adjacency_matrix"].astype(jnp.float32)
    X = batch["node_features"].astype(jnp.float32)
    centers = batch["center_indices"].astype(jnp.int32)
    node_types = batch["node_types"].astype(jnp.int32)
    timestamp = jnp.asarray(batch["timestamp"], jnp.int32)

    n = X.shape[0]
    H = params["out_w"].shape[1]
    HH = H // 2

    # ----- time embedding + input concat -----
    max_ts = params["time_emb"].shape[0] - 1
    ts = jnp.clip(timestamp, 0, max_ts)
    time_row = params["time_emb"][ts]                                     # [time_dim]
    time_dim = params["time_emb"].shape[1]
    X_time = jnp.concatenate(
        [X, jnp.broadcast_to(time_row[None, :], (n, time_dim))], axis=1)

    # ----- degree-normalized adjacency (computed once, reused) -----
    A_cl = jnp.clip(A, 0.0, 1.0)
    A_norm = A_cl / (jnp.sum(A_cl, axis=1, keepdims=True) + 1e-8)

    # ----- split + fold edge-MLP layer-1 weights for the factorized form -----
    ew1 = params["edge_mlp"]["w1"]
    eb1 = params["edge_mlp"]["b1"]
    e1p = ew1[:H]                     # acts on (H_v[i] + H_v[j])
    e1g = ew1[H:2 * H]                # acts on h_G
    e1c = ew1[2 * H:2 * H + 1] + eb1  # constant-1 feature + bias     [1, HH]

    ag = params["aug_gnn"]
    X_proj, Pc = pl.pallas_call(
        _aug_path_kernel,
        out_shape=(jax.ShapeDtypeStruct((n, H), jnp.float32),
                   jax.ShapeDtypeStruct((n, HH), jnp.float32)),
        in_specs=[_vmem()] * 13,
        out_specs=(_vmem(), _vmem()),
    )(X_time, A_norm, params["fp_w"], params["fp_b"],
      ag["w1"], ag["b1"], ag["w2"], ag["b2"], ag["w3"], ag["b3"],
      e1p, e1g, e1c)

    # ----- pairwise edge scores (lane-dense [n, n]) -----
    scores = pl.pallas_call(
        _pair_score_kernel,
        out_shape=jax.ShapeDtypeStruct((n, n), jnp.float32),
        in_specs=[_vmem(), _vmem(), _smem(), _smem()],
        out_specs=_vmem(),
    )(Pc, Pc.T, params["edge_mlp"]["w2"][:, 0], params["edge_mlp"]["b2"][0])

    # ----- Gumbel top-k edge selection (fully traced: threshold on sorted logits) -----
    k_gumbel, k_perm = jax.random.split(rng)
    u = jax.random.uniform(k_gumbel, (n, n))
    gumbel = -jnp.log(-jnp.log(u + 1e-8) + 1e-8)
    pert = (scores + gumbel).reshape(-1)
    edge_mask = (A.reshape(-1) != 0)
    num_edges = jnp.sum(edge_mask.astype(jnp.int32))
    num_keep = jnp.maximum(
        jnp.int32(1), (k_ratio * num_edges.astype(jnp.float32)).astype(jnp.int32))
    masked = jnp.where(edge_mask, pert, -jnp.inf)
    thresh = jnp.sort(masked)[::-1][num_keep - 1]
    keep = jnp.logical_and(masked >= thresh, edge_mask).astype(jnp.float32)
    A_aug = A * keep.reshape(n, n)

    A_aug_cl = jnp.clip(A_aug, 0.0, 1.0)
    A_aug_norm = A_aug_cl / (jnp.sum(A_aug_cl, axis=1, keepdims=True) + 1e-8)

    # ----- negative sampling (feature row shuffle) -----
    perm = jax.random.permutation(k_perm, n)
    X_neg = X_proj[perm]

    # ----- 3 encoder passes batched on grid=(3,) with resident weights -----
    type_emb = params["enc_type_emb"][node_types]                         # [n, H//4]
    type_add = 0.1 * jnp.pad(type_emb, ((0, 0), (0, H - type_emb.shape[1])))
    A_stack = jnp.stack([A_norm, A_aug_norm, A_norm])                     # [3, n, n]
    X_stack = jnp.stack([X_proj, X_proj, X_neg])                          # [3, n, H]

    enc = params["enc_gnn"]
    Z_stack = pl.pallas_call(
        _encoder_kernel,
        out_shape=jax.ShapeDtypeStruct((3, n, H), jnp.float32),
        grid=(3,),
        in_specs=[
            pl.BlockSpec((None, n, n), lambda g: (g, 0, 0)),
            pl.BlockSpec((None, n, H), lambda g: (g, 0, 0)),
            pl.BlockSpec((n, H), lambda g: (0, 0)),
            pl.BlockSpec((H, H), lambda g: (0, 0)),
            pl.BlockSpec((1, H), lambda g: (0, 0)),
            pl.BlockSpec((H, H), lambda g: (0, 0)),
            pl.BlockSpec((1, H), lambda g: (0, 0)),
            pl.BlockSpec((H, H), lambda g: (0, 0)),
            pl.BlockSpec((1, H), lambda g: (0, 0)),
        ],
        out_specs=pl.BlockSpec((None, n, H), lambda g: (g, 0, 0)),
        compiler_params=pltpu.CompilerParams(dimension_semantics=("parallel",)),
    )(A_stack, X_stack, type_add,
      enc["w1"], enc["b1"], enc["w2"], enc["b2"], enc["w3"], enc["b3"])

    Z_orig, Z_aug, Z_neg = Z_stack[0], Z_stack[1], Z_stack[2]

    # ----- proj_head + output_proj + centers-only neighbor aggregation -----
    n_centers = int(centers.shape[0])
    if n_centers == 0:
        centers_eff = jnp.zeros((1,), jnp.int32)
        sub_scale = 0.0
    else:
        centers_eff = centers
        sub_scale = 1.0
    C = centers_eff.shape[0]

    A_norm_loss = A / (jnp.sum(A, axis=1, keepdims=True) + 1e-8)
    A_c = A_norm_loss[centers_eff]                                        # [C, n]
    Zo_c = Z_orig[centers_eff]
    Za_c = Z_aug[centers_eff]

    ph = params["proj_head"]
    Xp, out_emb, So, Sa = pl.pallas_call(
        _post_kernel,
        out_shape=(jax.ShapeDtypeStruct((n, H), jnp.float32),
                   jax.ShapeDtypeStruct((n, H), jnp.float32),
                   jax.ShapeDtypeStruct((C, H), jnp.float32),
                   jax.ShapeDtypeStruct((C, H), jnp.float32)),
        in_specs=[_vmem()] * 12,
        out_specs=(_vmem(), _vmem(), _vmem(), _vmem()),
    )(X_proj, Z_orig, Z_aug, A_c, Zo_c, Za_c,
      ph["w1"], ph["b1"], ph["w2"], ph["b2"],
      params["out_w"], params["out_b"])

    # ----- multi-scale contrastive losses -----
    loss_graph = graph_contrastive_loss(Z_orig, Z_neg, tau)
    loss_node = node_contrastive_loss_from_proj(Z_orig, Xp, perm, tau)
    loss_sub = subgraph_contrastive_loss_from_summaries(So, Sa, tau) * sub_scale
    total = jnp.clip(alpha * loss_graph + beta * loss_node + gamma * loss_sub, 0.0, 20.0)

    return total, out_emb


# --------------------------------------------------------------------------
# Main
# --------------------------------------------------------------------------

if __name__ == "__main__":
    N, INPUT_DIM, HIDDEN, TIME_DIM = 16, 8, 32, 8
    K_RATIO, ALPHA, BETA, GAMMA, TAU = 0.5, 1.0, 0.5, 0.5, 0.2

    params = init_params(jax.random.PRNGKey(0), INPUT_DIM, HIDDEN, TIME_DIM)

    k1, k2, k3, k4 = jax.random.split(jax.random.PRNGKey(0), 4)
    X = jax.random.normal(k1, (N, INPUT_DIM), jnp.float32)
    A_rand = (jax.random.uniform(k2, (N, N)) < 0.3).astype(jnp.float32)
    A = jnp.maximum(A_rand, A_rand.T) * (1.0 - jnp.eye(N, dtype=jnp.float32))
    A = A.at[0, 1].set(1.0).at[1, 0].set(1.0)   # guarantee at least one edge
    node_types = jax.random.randint(k3, (N,), 0, 5)
    center_indices = jnp.array([0, 3, 7, 12], dtype=jnp.int32)

    batch = {
        "adjacency_matrix": A,
        "node_features": X,
        "center_indices": center_indices,
        "node_types": node_types,
        "timestamp": jnp.int32(17),
    }

    fwd = jax.jit(functools.partial(
        temporal_mscia_forward,
        k_ratio=K_RATIO, alpha=ALPHA, beta=BETA, gamma=GAMMA, tau=TAU))

    loss, out_emb = fwd(params, batch, k4)
    jax.block_until_ready((loss, out_emb))
    assert out_emb.shape == (N, HIDDEN)
    assert loss.shape == ()
    print("KERNEL_OK")
</pallas_src>

<mosaic_0001>
module attributes {stable_mosaic.version = 11 : i64} {
  func.func @_aug_path_kernel(%arg0: memref<16x16xf32, #tpu.memory_space<vmem>>, %arg1: memref<16x16xf32, #tpu.memory_space<vmem>>, %arg2: memref<16x32xf32, #tpu.memory_space<vmem>>, %arg3: memref<1x32xf32, #tpu.memory_space<vmem>>, %arg4: memref<32x32xf32, #tpu.memory_space<vmem>>, %arg5: memref<1x32xf32, #tpu.memory_space<vmem>>, %arg6: memref<32x32xf32, #tpu.memory_space<vmem>>, %arg7: memref<1x32xf32, #tpu.memory_space<vmem>>, %arg8: memref<32x32xf32, #tpu.memory_space<vmem>>, %arg9: memref<1x32xf32, #tpu.memory_space<vmem>>, %arg10: memref<32x16xf32, #tpu.memory_space<vmem>>, %arg11: memref<32x16xf32, #tpu.memory_space<vmem>>, %arg12: memref<1x16xf32, #tpu.memory_space<vmem>>, %arg13: memref<16x32xf32, #tpu.memory_space<vmem>>, %arg14: memref<16x16xf32, #tpu.memory_space<vmem>>) attributes {dimension_semantics = [], scalar_prefetch = 0 : i64, scratch_operands = 0 : i64, tpu.core_type = #tpu.core_type<tc>} {
    %c0 = arith.constant 0 : index
    %c0_0 = arith.constant 0 : index
    %0 = vector.load %arg0[%c0, %c0_0] : memref<16x16xf32, #tpu.memory_space<vmem>>, vector<16x16xf32>
    %c0_1 = arith.constant 0 : index
    %c0_2 = arith.constant 0 : index
    %1 = vector.load %arg2[%c0_1, %c0_2] : memref<16x32xf32, #tpu.memory_space<vmem>>, vector<16x32xf32>
    %2 = arith.truncf %0 : vector<16x16xf32> to vector<16x16xbf16>
    %3 = arith.truncf %1 : vector<16x32xf32> to vector<16x32xbf16>
    %cst = arith.constant dense<0.000000e+00> : vector<16x32xf32>
    %4 = tpu.matmul %2, %3, %cst {dimension_numbers = #tpu.dot_dimension_numbers<[1], [0], [0], [1], [0, 0, 1, 1], [], []>} : vector<16x16xbf16>, vector<16x32xbf16>, vector<16x32xf32> -> vector<16x32xf32>
    %c0_3 = arith.constant 0 : index
    %c0_4 = arith.constant 0 : index
    %5 = vector.load %arg3[%c0_3, %c0_4] : memref<1x32xf32, #tpu.memory_space<vmem>>, vector<1x32xf32>
    %6 = vector.broadcast %5 : vector<1x32xf32> to vector<16x32xf32>
    %7 = arith.addf %4, %6 : vector<16x32xf32>
    %cst_5 = arith.constant 0.000000e+00 : f32
    %8 = vector.broadcast %cst_5 : f32 to vector<16x32xf32>
    %9 = arith.maximumf %7, %8 : vector<16x32xf32>
    %c0_6 = arith.constant 0 : index
    %c0_7 = arith.constant 0 : index
    %10 = vector.load %arg13[%c0_6, %c0_7] : memref<16x32xf32, #tpu.memory_space<vmem>>, vector<16x32xf32>
    tpu.vector_store %arg13[%c0_6, %c0_7], %9 {strides = array<i32>} : memref<16x32xf32, #tpu.memory_space<vmem>>, vector<16x32xf32>,
    %cst_8 = arith.constant -1.000000e+01 : f32
    %cst_9 = arith.constant 1.000000e+01 : f32
    %11 = vector.broadcast %cst_8 : f32 to vector<16x32xf32>
    %12 = arith.maximumf %11, %9 : vector<16x32xf32>
    %13 = vector.broadcast %cst_9 : f32 to vector<16x32xf32>
    %14 = arith.minimumf %13, %12 : vector<16x32xf32>
    %c0_10 = arith.constant 0 : index
    %c0_11 = arith.constant 0 : index
    %15 = vector.load %arg4[%c0_10, %c0_11] : memref<32x32xf32, #tpu.memory_space<vmem>>, vector<32x32xf32>
    %16 = arith.truncf %14 : vector<16x32xf32> to vector<16x32xbf16>
    %17 = arith.truncf %15 : vector<32x32xf32> to vector<32x32xbf16>
    %cst_12 = arith.constant dense<0.000000e+00> : vector<16x32xf32>
    %18 = tpu.matmul %16, %17, %cst_12 {dimension_numbers = #tpu.dot_dimension_numbers<[1], [0], [0], [1], [0, 0, 1, 1], [], []>} : vector<16x32xbf16>, vector<32x32xbf16>, vector<16x32xf32> -> vector<16x32xf32>
    %c0_13 = arith.constant 0 : index
    %c0_14 = arith.constant 0 : index
    %19 = vector.load %arg5[%c0_13, %c0_14] : memref<1x32xf32, #tpu.memory_space<vmem>>, vector<1x32xf32>
    %20 = vector.broadcast %19 : vector<1x32xf32> to vector<16x32xf32>
    %21 = arith.addf %18, %20 : vector<16x32xf32>
    %cst_15 = arith.constant 0.000000e+00 : f32
    %22 = vector.broadcast %cst_15 : f32 to vector<16x32xf32>
    %23 = arith.maximumf %21, %22 : vector<16x32xf32>
    %c0_16 = arith.constant 0 : index
    %c0_17 = arith.constant 0 : index
    %24 = vector.load %arg6[%c0_16, %c0_17] : memref<32x32xf32, #tpu.memory_space<vmem>>, vector<32x32xf32>
    %25 = arith.truncf %23 : vector<16x32xf32> to vector<16x32xbf16>
    %26 = arith.truncf %24 : vector<32x32xf32> to vector<32x32xbf16>
    %cst_18 = arith.constant dense<0.000000e+00> : vector<16x32xf32>
    %27 = tpu.matmul %25, %26, %cst_18 {dimension_numbers = #tpu.dot_dimension_numbers<[1], [0], [0], [1], [0, 0, 1, 1], [], []>} : vector<16x32xbf16>, vector<32x32xbf16>, vector<16x32xf32> -> vector<16x32xf32>
    %c0_19 = arith.constant 0 : index
    %c0_20 = arith.constant 0 : index
    %28 = vector.load %arg7[%c0_19, %c0_20] : memref<1x32xf32, #tpu.memory_space<vmem>>, vector<1x32xf32>
    %29 = vector.broadcast %28 : vector<1x32xf32> to vector<16x32xf32>
    %30 = arith.addf %27, %29 : vector<16x32xf32>
    %cst_21 = arith.constant 0.000000e+00 : f32
    %31 = vector.broadcast %cst_21 : f32 to vector<16x32xf32>
    %32 = arith.maximumf %30, %31 : vector<16x32xf32>
    %c0_22 = arith.constant 0 : index
    %c0_23 = arith.constant 0 : index
    %33 = vector.load %arg1[%c0_22, %c0_23] : memref<16x16xf32, #tpu.memory_space<vmem>>, vector<16x16xf32>
    %34 = arith.truncf %33 : vector<16x16xf32> to vector<16x16xbf16>
    %35 = arith.truncf %32 : vector<16x32xf32> to vector<16x32xbf16>
    %cst_24 = arith.constant dense<0.000000e+00> : vector<16x32xf32>
    %36 = tpu.matmul %34, %35, %cst_24 {dimension_numbers = #tpu.dot_dimension_numbers<[1], [0], [0], [1], [0, 0, 1, 1], [], []>} : vector<16x16xbf16>, vector<16x32xbf16>, vector<16x32xf32> -> vector<16x32xf32>
    %37 = arith.addf %23, %36 : vector<16x32xf32>
    %c0_25 = arith.constant 0 : index
    %c0_26 = arith.constant 0 : index
    %38 = vector.load %arg8[%c0_25, %c0_26] : memref<32x32xf32, #tpu.memory_space<vmem>>, vector<32x32xf32>
    %39 = arith.truncf %37 : vector<16x32xf32> to vector<16x32xbf16>
    %40 = arith.truncf %38 : vector<32x32xf32> to vector<32x32xbf16>
    %cst_27 = arith.constant dense<0.000000e+00> : vector<16x32xf32>
    %41 = tpu.matmul %39, %40, %cst_27 {dimension_numbers = #tpu.dot_dimension_numbers<[1], [0], [0], [1], [0, 0, 1, 1], [], []>} : vector<16x32xbf16>, vector<32x32xbf16>, vector<16x32xf32> -> vector<16x32xf32>
    %c0_28 = arith.constant 0 : index
    %c0_29 = arith.constant 0 : index
    %42 = vector.load %arg9[%c0_28, %c0_29] : memref<1x32xf32, #tpu.memory_space<vmem>>, vector<1x32xf32>
    %43 = vector.broadcast %42 : vector<1x32xf32> to vector<16x32xf32>
    %44 = arith.addf %41, %43 : vector<16x32xf32>
    %45 = math.tanh %44 : vector<16x32xf32>
    %cst_30 = arith.constant dense<0.000000e+00> : vector<32xf32>
    %46 = vector.multi_reduction <add>, %45, %cst_30 [0] : vector<16x32xf32> to vector<32xf32>
    %47 = vector.shape_cast %46 : vector<32xf32> to vector<1x32xf32>
    %cst_31 = arith.constant 6.250000e-02 : f32
    %48 = vector.broadcast %cst_31 : f32 to vector<1x32xf32>
    %49 = arith.mulf %47, %48 : vector<1x32xf32>
    %c0_32 = arith.constant 0 : index
    %c0_33 = arith.constant 0 : index
    %50 = vector.load %arg11[%c0_32, %c0_33] : memref<32x16xf32, #tpu.memory_space<vmem>>, vector<32x16xf32>
    %51 = arith.truncf %49 : vector<1x32xf32> to vector<1x32xbf16>
    %52 = arith.truncf %50 : vector<32x16xf32> to vector<32x16xbf16>
    %cst_34 = arith.constant dense<0.000000e+00> : vector<1x16xf32>
    %53 = tpu.matmul %51, %52, %cst_34 {dimension_numbers = #tpu.dot_dimension_numbers<[1], [0], [0], [1], [0, 0, 1, 1], [], []>} : vector<1x32xbf16>, vector<32x16xbf16>, vector<1x16xf32> -> vector<1x16xf32>
    %c0_35 = arith.constant 0 : index
    %c0_36 = arith.constant 0 : index
    %54 = vector.load %arg12[%c0_35, %c0_36] : memref<1x16xf32, #tpu.memory_space<vmem>>, vector<1x16xf32>
    %55 = arith.addf %53, %54 : vector<1x16xf32>
    %c0_37 = arith.constant 0 : index
    %c0_38 = arith.constant 0 : index
    %56 = vector.load %arg10[%c0_37, %c0_38] : memref<32x16xf32, #tpu.memory_space<vmem>>, vector<32x16xf32>
    %57 = arith.truncf %45 : vector<16x32xf32> to vector<16x32xbf16>
    %58 = arith.truncf %56 : vector<32x16xf32> to vector<32x16xbf16>
    %cst_39 = arith.constant dense<0.000000e+00> : vector<16x16xf32>
    %59 = tpu.matmul %57, %58, %cst_39 {dimension_numbers = #tpu.dot_dimension_numbers<[1], [0], [0], [1], [0, 0, 1, 1], [], []>} : vector<16x32xbf16>, vector<32x16xbf16>, vector<16x16xf32> -> vector<16x16xf32>
    %cst_40 = arith.constant 5.000000e-01 : f32
    %60 = vector.broadcast %cst_40 : f32 to vector<1x16xf32>
    %61 = arith.mulf %60, %55 : vector<1x16xf32>
    %62 = vector.broadcast %61 : vector<1x16xf32> to vector<16x16xf32>
    %63 = arith.addf %59, %62 : vector<16x16xf32>
    %c0_41 = arith.constant 0 : index
    %c0_42 = arith.constant 0 : index
    %64 = vector.load %arg14[%c0_41, %c0_42] : memref<16x16xf32, #tpu.memory_space<vmem>>, vector<16x16xf32>
    tpu.vector_store %arg14[%c0_41, %c0_42], %63 {strides = array<i32>} : memref<16x16xf32, #tpu.memory_space<vmem>>, vector<16x16xf32>,
    return
  }
}

module attributes {stable_mosaic.version = 11 : i64} {
  func.func @_pair_score_kernel(%arg0: memref<16x16xf32, #tpu.memory_space<vmem>>, %arg1: memref<16x16xf32, #tpu.memory_space<vmem>>, %arg2: memref<16xf32, #tpu.memory_space<smem>>, %arg3: memref<1xf32, #tpu.memory_space<smem>>, %arg4: memref<16x16xf32, #tpu.memory_space<vmem>>) attributes {dimension_semantics = [], scalar_prefetch = 0 : i64, scratch_operands = 0 : i64, tpu.core_type = #tpu.core_type<tc>} {
    %cst = arith.constant 0.000000e+00 : f32
    %0 = vector.broadcast %cst : f32 to vector<16x16xf32>
    %c0 = arith.constant 0 : index
    %c0_0 = arith.constant 0 : index
    %1 = vector.load %arg0[%c0, %c0_0] : memref<16x16xf32, #tpu.memory_space<vmem>>, vector<16x1xf32>
    %c0_1 = arith.constant 0 : index
    %c0_2 = arith.constant 0 : index
    %2 = vector.load %arg1[%c0_1, %c0_2] : memref<16x16xf32, #tpu.memory_space<vmem>>, vector<1x16xf32>
    %3 = vector.broadcast %1 : vector<16x1xf32> to vector<16x16xf32>
    %4 = vector.broadcast %2 : vector<1x16xf32> to vector<16x16xf32>
    %5 = arith.addf %3, %4 : vector<16x16xf32>
    %cst_3 = arith.constant 0.000000e+00 : f32
    %6 = vector.broadcast %cst_3 : f32 to vector<16x16xf32>
    %7 = arith.maximumf %5, %6 : vector<16x16xf32>
    %c0_4 = arith.constant 0 : index
    %8 = memref.load %arg2[%c0_4] : memref<16xf32, #tpu.memory_space<smem>>
    %9 = vector.broadcast %8 : f32 to vector<16x16xf32>
    %10 = arith.mulf %7, %9 : vector<16x16xf32>
    %11 = arith.addf %0, %10 : vector<16x16xf32>
    %c0_5 = arith.constant 0 : index
    %c1 = arith.constant 1 : index
    %12 = vector.load %arg0[%c0_5, %c1] : memref<16x16xf32, #tpu.memory_space<vmem>>, vector<16x1xf32>
    %c1_6 = arith.constant 1 : index
    %c0_7 = arith.constant 0 : index
    %13 = vector.load %arg1[%c1_6, %c0_7] : memref<16x16xf32, #tpu.memory_space<vmem>>, vector<1x16xf32>
    %14 = vector.broadcast %12 : vector<16x1xf32> to vector<16x16xf32>
    %15 = vector.broadcast %13 : vector<1x16xf32> to vector<16x16xf32>
    %16 = arith.addf %14, %15 : vector<16x16xf32>
    %cst_8 = arith.constant 0.000000e+00 : f32
    %17 = vector.broadcast %cst_8 : f32 to vector<16x16xf32>
    %18 = arith.maximumf %16, %17 : vector<16x16xf32>
    %c1_9 = arith.constant 1 : index
    %19 = memref.load %arg2[%c1_9] : memref<16xf32, #tpu.memory_space<smem>>
    %20 = vector.broadcast %19 : f32 to vector<16x16xf32>
    %21 = arith.mulf %18, %20 : vector<16x16xf32>
    %22 = arith.addf %11, %21 : vector<16x16xf32>
    %c0_10 = arith.constant 0 : index
    %c2 = arith.constant 2 : index
    %23 = vector.load %arg0[%c0_10, %c2] : memref<16x16xf32, #tpu.memory_space<vmem>>, vector<16x1xf32>
    %c2_11 = arith.constant 2 : index
    %c0_12 = arith.constant 0 : index
    %24 = vector.load %arg1[%c2_11, %c0_12] : memref<16x16xf32, #tpu.memory_space<vmem>>, vector<1x16xf32>
    %25 = vector.broadcast %23 : vector<16x1xf32> to vector<16x16xf32>
    %26 = vector.broadcast %24 : vector<1x16xf32> to vector<16x16xf32>
    %27 = arith.addf %25, %26 : vector<16x16xf32>
    %cst_13 = arith.constant 0.000000e+00 : f32
    %28 = vector.broadcast %cst_13 : f32 to vector<16x16xf32>
    %29 = arith.maximumf %27, %28 : vector<16x16xf32>
    %c2_14 = arith.constant 2 : index
    %30 = memref.load %arg2[%c2_14] : memref<16xf32, #tpu.memory_space<smem>>
    %31 = vector.broadcast %30 : f32 to vector<16x16xf32>
    %32 = arith.mulf %29, %31 : vector<16x16xf32>
    %33 = arith.addf %22, %32 : vector<16x16xf32>
    %c0_15 = arith.constant 0 : index
    %c3 = arith.constant 3 : index
    %34 = vector.load %arg0[%c0_15, %c3] : memref<16x16xf32, #tpu.memory_space<vmem>>, vector<16x1xf32>
    %c3_16 = arith.constant 3 : index
    %c0_17 = arith.constant 0 : index
    %35 = vector.load %arg1[%c3_16, %c0_17] : memref<16x16xf32, #tpu.memory_space<vmem>>, vector<1x16xf32>
    %36 = vector.broadcast %34 : vector<16x1xf32> to vector<16x16xf32>
    %37 = vector.broadcast %35 : vector<1x16xf32> to vector<16x16xf32>
    %38 = arith.addf %36, %37 : vector<16x16xf32>
    %cst_18 = arith.constant 0.000000e+00 : f32
    %39 = vector.broadcast %cst_18 : f32 to vector<16x16xf32>
    %40 = arith.maximumf %38, %39 : vector<16x16xf32>
    %c3_19 = arith.constant 3 : index
    %41 = memref.load %arg2[%c3_19] : memref<16xf32, #tpu.memory_space<smem>>
    %42 = vector.broadcast %41 : f32 to vector<16x16xf32>
    %43 = arith.mulf %40, %42 : vector<16x16xf32>
    %44 = arith.addf %33, %43 : vector<16x16xf32>
    %c0_20 = arith.constant 0 : index
    %c4 = arith.constant 4 : index
    %45 = vector.load %arg0[%c0_20, %c4] : memref<16x16xf32, #tpu.memory_space<vmem>>, vector<16x1xf32>
    %c4_21 = arith.constant 4 : index
    %c0_22 = arith.constant 0 : index
    %46 = vector.load %arg1[%c4_21, %c0_22] : memref<16x16xf32, #tpu.memory_space<vmem>>, vector<1x16xf32>
    %47 = vector.broadcast %45 : vector<16x1xf32> to vector<16x16xf32>
    %48 = vector.broadcast %46 : vector<1x16xf32> to vector<16x16xf32>
    %49 = arith.addf %47, %48 : vector<16x16xf32>
    %cst_23 = arith.constant 0.000000e+00 : f32
    %50 = vector.broadcast %cst_23 : f32 to vector<16x16xf32>
    %51 = arith.maximumf %49, %50 : vector<16x16xf32>
    %c4_24 = arith.constant 4 : index
    %52 = memref.load %arg2[%c4_24] : memref<16xf32, #tpu.memory_space<smem>>
    %53 = vector.broadcast %52 : f32 to vector<16x16xf32>
    %54 = arith.mulf %51, %53 : vector<16x16xf32>
    %55 = arith.addf %44, %54 : vector<16x16xf32>
    %c0_25 = arith.constant 0 : index
    %c5 = arith.constant 5 : index
    %56 = vector.load %arg0[%c0_25, %c5] : memref<16x16xf32, #tpu.memory_space<vmem>>, vector<16x1xf32>
    %c5_26 = arith.constant 5 : index
    %c0_27 = arith.constant 0 : index
    %57 = vector.load %arg1[%c5_26, %c0_27] : memref<16x16xf32, #tpu.memory_space<vmem>>, vector<1x16xf32>
    %58 = vector.broadcast %56 : vector<16x1xf32> to vector<16x16xf32>
    %59 = vector.broadcast %57 : vector<1x16xf32> to vector<16x16xf32>
    %60 = arith.addf %58, %59 : vector<16x16xf32>
    %cst_28 = arith.constant 0.000000e+00 : f32
    %61 = vector.broadcast %cst_28 : f32 to vector<16x16xf32>
    %62 = arith.maximumf %60, %61 : vector<16x16xf32>
    %c5_29 = arith.constant 5 : index
    %63 = memref.load %arg2[%c5_29] : memref<16xf32, #tpu.memory_space<smem>>
    %64 = vector.broadcast %63 : f32 to vector<16x16xf32>
    %65 = arith.mulf %62, %64 : vector<16x16xf32>
    %66 = arith.addf %55, %65 : vector<16x16xf32>
    %c0_30 = arith.constant 0 : index
    %c6 = arith.constant 6 : index
    %67 = vector.load %arg0[%c0_30, %c6] : memref<16x16xf32, #tpu.memory_space<vmem>>, vector<16x1xf32>
    %c6_31 = arith.constant 6 : index
    %c0_32 = arith.constant 0 : index
    %68 = vector.load %arg1[%c6_31, %c0_32] : memref<16x16xf32, #tpu.memory_space<vmem>>, vector<1x16xf32>
    %69 = vector.broadcast %67 : vector<16x1xf32> to vector<16x16xf32>
    %70 = vector.broadcast %68 : vector<1x16xf32> to vector<16x16xf32>
    %71 = arith.addf %69, %70 : vector<16x16xf32>
    %cst_33 = arith.constant 0.000000e+00 : f32
    %72 = vector.broadcast %cst_33 : f32 to vector<16x16xf32>
    %73 = arith.maximumf %71, %72 : vector<16x16xf32>
    %c6_34 = arith.constant 6 : index
    %74 = memref.load %arg2[%c6_34] : memref<16xf32, #tpu.memory_space<smem>>
    %75 = vector.broadcast %74 : f32 to vector<16x16xf32>
    %76 = arith.mulf %73, %75 : vector<16x16xf32>
    %77 = arith.addf %66, %76 : vector<16x16xf32>
    %c0_35 = arith.constant 0 : index
    %c7 = arith.constant 7 : index
    %78 = vector.load %arg0[%c0_35, %c7] : memref<16x16xf32, #tpu.memory_space<vmem>>, vector<16x1xf32>
    %c7_36 = arith.constant 7 : index
    %c0_37 = arith.constant 0 : index
    %79 = vector.load %arg1[%c7_36, %c0_37] : memref<16x16xf32, #tpu.memory_space<vmem>>, vector<1x16xf32>
    %80 = vector.broadcast %78 : vector<16x1xf32> to vector<16x16xf32>
    %81 = vector.broadcast %79 : vector<1x16xf32> to vector<16x16xf32>
    %82 = arith.addf %80, %81 : vector<16x16xf32>
    %cst_38 = arith.constant 0.000000e+00 : f32
    %83 = vector.broadcast %cst_38 : f32 to vector<16x16xf32>
    %84 = arith.maximumf %82, %83 : vector<16x16xf32>
    %c7_39 = arith.constant 7 : index
    %85 = memref.load %arg2[%c7_39] : memref<16xf32, #tpu.memory_space<smem>>
    %86 = vector.broadcast %85 : f32 to vector<16x16xf32>
    %87 = arith.mulf %84, %86 : vector<16x16xf32>
    %88 = arith.addf %77, %87 : vector<16x16xf32>
    %c0_40 = arith.constant 0 : index
    %c8 = arith.constant 8 : index
    %89 = vector.load %arg0[%c0_40, %c8] : memref<16x16xf32, #tpu.memory_space<vmem>>, vector<16x1xf32>
    %c8_41 = arith.constant 8 : index
    %c0_42 = arith.constant 0 : index
    %90 = vector.load %arg1[%c8_41, %c0_42] : memref<16x16xf32, #tpu.memory_space<vmem>>, vector<1x16xf32>
    %91 = vector.broadcast %89 : vector<16x1xf32> to vector<16x16xf32>
    %92 = vector.broadcast %90 : vector<1x16xf32> to vector<16x16xf32>
    %93 = arith.addf %91, %92 : vector<16x16xf32>
    %cst_43 = arith.constant 0.000000e+00 : f32
    %94 = vector.broadcast %cst_43 : f32 to vector<16x16xf32>
    %95 = arith.maximumf %93, %94 : vector<16x16xf32>
    %c8_44 = arith.constant 8 : index
    %96 = memref.load %arg2[%c8_44] : memref<16xf32, #tpu.memory_space<smem>>
    %97 = vector.broadcast %96 : f32 to vector<16x16xf32>
    %98 = arith.mulf %95, %97 : vector<16x16xf32>
    %99 = arith.addf %88, %98 : vector<16x16xf32>
    %c0_45 = arith.constant 0 : index
    %c9 = arith.constant 9 : index
    %100 = vector.load %arg0[%c0_45, %c9] : memref<16x16xf32, #tpu.memory_space<vmem>>, vector<16x1xf32>
    %c9_46 = arith.constant 9 : index
    %c0_47 = arith.constant 0 : index
    %101 = vector.load %arg1[%c9_46, %c0_47] : memref<16x16xf32, #tpu.memory_space<vmem>>, vector<1x16xf32>
    %102 = vector.broadcast %100 : vector<16x1xf32> to vector<16x16xf32>
    %103 = vector.broadcast %101 : vector<1x16xf32> to vector<16x16xf32>
    %104 = arith.addf %102, %103 : vector<16x16xf32>
    %cst_48 = arith.constant 0.000000e+00 : f32
    %105 = vector.broadcast %cst_48 : f32 to vector<16x16xf32>
    %106 = arith.maximumf %104, %105 : vector<16x16xf32>
    %c9_49 = arith.constant 9 : index
    %107 = memref.load %arg2[%c9_49] : memref<16xf32, #tpu.memory_space<smem>>
    %108 = vector.broadcast %107 : f32 to vector<16x16xf32>
    %109 = arith.mulf %106, %108 : vector<16x16xf32>
    %110 = arith.addf %99, %109 : vector<16x16xf32>
    %c0_50 = arith.constant 0 : index
    %c10 = arith.constant 10 : index
    %111 = vector.load %arg0[%c0_50, %c10] : memref<16x16xf32, #tpu.memory_space<vmem>>, vector<16x1xf32>
    %c10_51 = arith.constant 10 : index
    %c0_52 = arith.constant 0 : index
    %112 = vector.load %arg1[%c10_51, %c0_52] : memref<16x16xf32, #tpu.memory_space<vmem>>, vector<1x16xf32>
    %113 = vector.broadcast %111 : vector<16x1xf32> to vector<16x16xf32>
    %114 = vector.broadcast %112 : vector<1x16xf32> to vector<16x16xf32>
    %115 = arith.addf %113, %114 : vector<16x16xf32>
    %cst_53 = arith.constant 0.000000e+00 : f32
    %116 = vector.broadcast %cst_53 : f32 to vector<16x16xf32>
    %117 = arith.maximumf %115, %116 : vector<16x16xf32>
    %c10_54 = arith.constant 10 : index
    %118 = memref.load %arg2[%c10_54] : memref<16xf32, #tpu.memory_space<smem>>
    %119 = vector.broadcast %118 : f32 to vector<16x16xf32>
    %120 = arith.mulf %117, %119 : vector<16x16xf32>
    %121 = arith.addf %110, %120 : vector<16x16xf32>
    %c0_55 = arith.constant 0 : index
    %c11 = arith.constant 11 : index
    %122 = vector.load %arg0[%c0_55, %c11] : memref<16x16xf32, #tpu.memory_space<vmem>>, vector<16x1xf32>
    %c11_56 = arith.constant 11 : index
    %c0_57 = arith.constant 0 : index
    %123 = vector.load %arg1[%c11_56, %c0_57] : memref<16x16xf32, #tpu.memory_space<vmem>>, vector<1x16xf32>
    %124 = vector.broadcast %122 : vector<16x1xf32> to vector<16x16xf32>
    %125 = vector.broadcast %123 : vector<1x16xf32> to vector<16x16xf32>
    %126 = arith.addf %124, %125 : vector<16x16xf32>
    %cst_58 = arith.constant 0.000000e+00 : f32
    %127 = vector.broadcast %cst_58 : f32 to vector<16x16xf32>
    %128 = arith.maximumf %126, %127 : vector<16x16xf32>
    %c11_59 = arith.constant 11 : index
    %129 = memref.load %arg2[%c11_59] : memref<16xf32, #tpu.memory_space<smem>>
    %130 = vector.broadcast %129 : f32 to vector<16x16xf32>
    %131 = arith.mulf %128, %130 : vector<16x16xf32>
    %132 = arith.addf %121, %131 : vector<16x16xf32>
    %c0_60 = arith.constant 0 : index
    %c12 = arith.constant 12 : index
    %133 = vector.load %arg0[%c0_60, %c12] : memref<16x16xf32, #tpu.memory_space<vmem>>, vector<16x1xf32>
    %c12_61 = arith.constant 12 : index
    %c0_62 = arith.constant 0 : index
    %134 = vector.load %arg1[%c12_61, %c0_62] : memref<16x16xf32, #tpu.memory_space<vmem>>, vector<1x16xf32>
    %135 = vector.broadcast %133 : vector<16x1xf32> to vector<16x16xf32>
    %136 = vector.broadcast %134 : vector<1x16xf32> to vector<16x16xf32>
    %137 = arith.addf %135, %136 : vector<16x16xf32>
    %cst_63 = arith.constant 0.000000e+00 : f32
    %138 = vector.broadcast %cst_63 : f32 to vector<16x16xf32>
    %139 = arith.maximumf %137, %138 : vector<16x16xf32>
    %c12_64 = arith.constant 12 : index
    %140 = memref.load %arg2[%c12_64] : memref<16xf32, #tpu.memory_space<smem>>
    %141 = vector.broadcast %140 : f32 to vector<16x16xf32>
    %142 = arith.mulf %139, %141 : vector<16x16xf32>
    %143 = arith.addf %132, %142 : vector<16x16xf32>
    %c0_65 = arith.constant 0 : index
    %c13 = arith.constant 13 : index
    %144 = vector.load %arg0[%c0_65, %c13] : memref<16x16xf32, #tpu.memory_space<vmem>>, vector<16x1xf32>
    %c13_66 = arith.constant 13 : index
    %c0_67 = arith.constant 0 : index
    %145 = vector.load %arg1[%c13_66, %c0_67] : memref<16x16xf32, #tpu.memory_space<vmem>>, vector<1x16xf32>
    %146 = vector.broadcast %144 : vector<16x1xf32> to vector<16x16xf32>
    %147 = vector.broadcast %145 : vector<1x16xf32> to vector<16x16xf32>
    %148 = arith.addf %146, %147 : vector<16x16xf32>
    %cst_68 = arith.constant 0.000000e+00 : f32
    %149 = vector.broadcast %cst_68 : f32 to vector<16x16xf32>
    %150 = arith.maximumf %148, %149 : vector<16x16xf32>
    %c13_69 = arith.constant 13 : index
    %151 = memref.load %arg2[%c13_69] : memref<16xf32, #tpu.memory_space<smem>>
    %152 = vector.broadcast %151 : f32 to vector<16x16xf32>
    %153 = arith.mulf %150, %152 : vector<16x16xf32>
    %154 = arith.addf %143, %153 : vector<16x16xf32>
    %c0_70 = arith.constant 0 : index
    %c14 = arith.constant 14 : index
    %155 = vector.load %arg0[%c0_70, %c14] : memref<16x16xf32, #tpu.memory_space<vmem>>, vector<16x1xf32>
    %c14_71 = arith.constant 14 : index
    %c0_72 = arith.constant 0 : index
    %156 = vector.load %arg1[%c14_71, %c0_72] : memref<16x16xf32, #tpu.memory_space<vmem>>, vector<1x16xf32>
    %157 = vector.broadcast %155 : vector<16x1xf32> to vector<16x16xf32>
    %158 = vector.broadcast %156 : vector<1x16xf32> to vector<16x16xf32>
    %159 = arith.addf %157, %158 : vector<16x16xf32>
    %cst_73 = arith.constant 0.000000e+00 : f32
    %160 = vector.broadcast %cst_73 : f32 to vector<16x16xf32>
    %161 = arith.maximumf %159, %160 : vector<16x16xf32>
    %c14_74 = arith.constant 14 : index
    %162 = memref.load %arg2[%c14_74] : memref<16xf32, #tpu.memory_space<smem>>
    %163 = vector.broadcast %162 : f32 to vector<16x16xf32>
    %164 = arith.mulf %161, %163 : vector<16x16xf32>
    %165 = arith.addf %154, %164 : vector<16x16xf32>
    %c0_75 = arith.constant 0 : index
    %c15 = arith.constant 15 : index
    %166 = vector.load %arg0[%c0_75, %c15] : memref<16x16xf32, #tpu.memory_space<vmem>>, vector<16x1xf32>
    %c15_76 = arith.constant 15 : index
    %c0_77 = arith.constant 0 : index
    %167 = vector.load %arg1[%c15_76, %c0_77] : memref<16x16xf32, #tpu.memory_space<vmem>>, vector<1x16xf32>
    %168 = vector.broadcast %166 : vector<16x1xf32> to vector<16x16xf32>
    %169 = vector.broadcast %167 : vector<1x16xf32> to vector<16x16xf32>
    %170 = arith.addf %168, %169 : vector<16x16xf32>
    %cst_78 = arith.constant 0.000000e+00 : f32
    %171 = vector.broadcast %cst_78 : f32 to vector<16x16xf32>
    %172 = arith.maximumf %170, %171 : vector<16x16xf32>
    %c15_79 = arith.constant 15 : index
    %173 = memref.load %arg2[%c15_79] : memref<16xf32, #tpu.memory_space<smem>>
    %174 = vector.broadcast %173 : f32 to vector<16x16xf32>
    %175 = arith.mulf %172, %174 : vector<16x16xf32>
    %176 = arith.addf %165, %175 : vector<16x16xf32>
    %c0_80 = arith.constant 0 : index
    %177 = memref.load %arg3[%c0_80] : memref<1xf32, #tpu.memory_space<smem>>
    %178 = vector.broadcast %177 : f32 to vector<16x16xf32>
    %179 = arith.addf %176, %178 : vector<16x16xf32>
    %180 = math.tanh %179 : vector<16x16xf32>
    %c0_81 = arith.constant 0 : index
    %c0_82 = arith.constant 0 : index
    %181 = vector.load %arg4[%c0_81, %c0_82] : memref<16x16xf32, #tpu.memory_space<vmem>>, vector<16x16xf32>
    tpu.vector_store %arg4[%c0_81, %c0_82], %180 {strides = array<i32>} : memref<16x16xf32, #tpu.memory_space<vmem>>, vector<16x16xf32>,
    return
  }
}

module attributes {stable_mosaic.version = 11 : i64} {
  func.func @_encoder_kernel(%arg0: i32, %arg1: memref<1x16x16xf32, #tpu.memory_space<vmem>>, %arg2: memref<1x16x32xf32, #tpu.memory_space<vmem>>, %arg3: memref<16x32xf32, #tpu.memory_space<vmem>>, %arg4: memref<32x32xf32, #tpu.memory_space<vmem>>, %arg5: memref<1x32xf32, #tpu.memory_space<vmem>>, %arg6: memref<32x32xf32, #tpu.memory_space<vmem>>, %arg7: memref<1x32xf32, #tpu.memory_space<vmem>>, %arg8: memref<32x32xf32, #tpu.memory_space<vmem>>, %arg9: memref<1x32xf32, #tpu.memory_space<vmem>>, %arg10: memref<1x16x32xf32, #tpu.memory_space<vmem>>) attributes {dimension_semantics = [#tpu.dimension_semantics<parallel>], iteration_bounds = array<i64: 3>, scalar_prefetch = 0 : i64, scratch_operands = 0 : i64, tpu.core_type = #tpu.core_type<tc>, window_params = [{transform_indices = @transform_0, window_bounds = array<i64: 1, 16, 16>}, {transform_indices = @transform_1, window_bounds = array<i64: 1, 16, 32>}, {pipeline_mode = #tpu.pipeline_mode<synchronous>, transform_indices = @transform_2, window_bounds = array<i64: 16, 32>}, {pipeline_mode = #tpu.pipeline_mode<synchronous>, transform_indices = @transform_3, window_bounds = array<i64: 32, 32>}, {pipeline_mode = #tpu.pipeline_mode<synchronous>, transform_indices = @transform_4, window_bounds = array<i64: 1, 32>}, {pipeline_mode = #tpu.pipeline_mode<synchronous>, transform_indices = @transform_5, window_bounds = array<i64: 32, 32>}, {pipeline_mode = #tpu.pipeline_mode<synchronous>, transform_indices = @transform_6, window_bounds = array<i64: 1, 32>}, {pipeline_mode = #tpu.pipeline_mode<synchronous>, transform_indices = @transform_7, window_bounds = array<i64: 32, 32>}, {pipeline_mode = #tpu.pipeline_mode<synchronous>, transform_indices = @transform_8, window_bounds = array<i64: 1, 32>}, {transform_indices = @transform_9, window_bounds = array<i64: 1, 16, 32>}]} {
    %c0 = arith.constant 0 : index
    %c0_0 = arith.constant 0 : index
    %c0_1 = arith.constant 0 : index
    %0 = vector.load %arg2[%c0, %c0_0, %c0_1] : memref<1x16x32xf32, #tpu.memory_space<vmem>>, vector<1x16x32xf32>
    %1 = vector.shape_cast %0 : vector<1x16x32xf32> to vector<16x32xf32>
    %cst = arith.constant -1.000000e+01 : f32
    %cst_2 = arith.constant 1.000000e+01 : f32
    %2 = vector.broadcast %cst : f32 to vector<16x32xf32>
    %3 = arith.maximumf %2, %1 : vector<16x32xf32>
    %4 = vector.broadcast %cst_2 : f32 to vector<16x32xf32>
    %5 = arith.minimumf %4, %3 : vector<16x32xf32>
    %c0_3 = arith.constant 0 : index
    %c0_4 = arith.constant 0 : index
    %6 = vector.load %arg4[%c0_3, %c0_4] : memref<32x32xf32, #tpu.memory_space<vmem>>, vector<32x32xf32>
    %7 = arith.truncf %5 : vector<16x32xf32> to vector<16x32xbf16>
    %8 = arith.truncf %6 : vector<32x32xf32> to vector<32x32xbf16>
    %cst_5 = arith.constant dense<0.000000e+00> : vector<16x32xf32>
    %9 = tpu.matmul %7, %8, %cst_5 {dimension_numbers = #tpu.dot_dimension_numbers<[1], [0], [0], [1], [0, 0, 1, 1], [], []>} : vector<16x32xbf16>, vector<32x32xbf16>, vector<16x32xf32> -> vector<16x32xf32>
    %c0_6 = arith.constant 0 : index
    %c0_7 = arith.constant 0 : index
    %10 = vector.load %arg5[%c0_6, %c0_7] : memref<1x32xf32, #tpu.memory_space<vmem>>, vector<1x32xf32>
    %11 = vector.broadcast %10 : vector<1x32xf32> to vector<16x32xf32>
    %12 = arith.addf %9, %11 : vector<16x32xf32>
    %cst_8 = arith.constant 0.000000e+00 : f32
    %13 = vector.broadcast %cst_8 : f32 to vector<16x32xf32>
    %14 = arith.maximumf %12, %13 : vector<16x32xf32>
    %c0_9 = arith.constant 0 : index
    %c0_10 = arith.constant 0 : index
    %15 = vector.load %arg3[%c0_9, %c0_10] : memref<16x32xf32, #tpu.memory_space<vmem>>, vector<16x32xf32>
    %16 = arith.addf %14, %15 : vector<16x32xf32>
    %c0_11 = arith.constant 0 : index
    %c0_12 = arith.constant 0 : index
    %17 = vector.load %arg6[%c0_11, %c0_12] : memref<32x32xf32, #tpu.memory_space<vmem>>, vector<32x32xf32>
    %18 = arith.truncf %16 : vector<16x32xf32> to vector<16x32xbf16>
    %19 = arith.truncf %17 : vector<32x32xf32> to vector<32x32xbf16>
    %cst_13 = arith.constant dense<0.000000e+00> : vector<16x32xf32>
    %20 = tpu.matmul %18, %19, %cst_13 {dimension_numbers = #tpu.dot_dimension_numbers<[1], [0], [0], [1], [0, 0, 1, 1], [], []>} : vector<16x32xbf16>, vector<32x32xbf16>, vector<16x32xf32> -> vector<16x32xf32>
    %c0_14 = arith.constant 0 : index
    %c0_15 = arith.constant 0 : index
    %21 = vector.load %arg7[%c0_14, %c0_15] : memref<1x32xf32, #tpu.memory_space<vmem>>, vector<1x32xf32>
    %22 = vector.broadcast %21 : vector<1x32xf32> to vector<16x32xf32>
    %23 = arith.addf %20, %22 : vector<16x32xf32>
    %cst_16 = arith.constant 0.000000e+00 : f32
    %24 = vector.broadcast %cst_16 : f32 to vector<16x32xf32>
    %25 = arith.maximumf %23, %24 : vector<16x32xf32>
    %c0_17 = arith.constant 0 : index
    %c0_18 = arith.constant 0 : index
    %c0_19 = arith.constant 0 : index
    %26 = vector.load %arg1[%c0_17, %c0_18, %c0_19] : memref<1x16x16xf32, #tpu.memory_space<vmem>>, vector<1x16x16xf32>
    %27 = vector.shape_cast %26 : vector<1x16x16xf32> to vector<16x16xf32>
    %28 = arith.truncf %27 : vector<16x16xf32> to vector<16x16xbf16>
    %29 = arith.truncf %25 : vector<16x32xf32> to vector<16x32xbf16>
    %cst_20 = arith.constant dense<0.000000e+00> : vector<16x32xf32>
    %30 = tpu.matmul %28, %29, %cst_20 {dimension_numbers = #tpu.dot_dimension_numbers<[1], [0], [0], [1], [0, 0, 1, 1], [], []>} : vector<16x16xbf16>, vector<16x32xbf16>, vector<16x32xf32> -> vector<16x32xf32>
    %31 = arith.addf %16, %30 : vector<16x32xf32>
    %c0_21 = arith.constant 0 : index
    %c0_22 = arith.constant 0 : index
    %32 = vector.load %arg8[%c0_21, %c0_22] : memref<32x32xf32, #tpu.memory_space<vmem>>, vector<32x32xf32>
    %33 = arith.truncf %31 : vector<16x32xf32> to vector<16x32xbf16>
    %34 = arith.truncf %32 : vector<32x32xf32> to vector<32x32xbf16>
    %cst_23 = arith.constant dense<0.000000e+00> : vector<16x32xf32>
    %35 = tpu.matmul %33, %34, %cst_23 {dimension_numbers = #tpu.dot_dimension_numbers<[1], [0], [0], [1], [0, 0, 1, 1], [], []>} : vector<16x32xbf16>, vector<32x32xbf16>, vector<16x32xf32> -> vector<16x32xf32>
    %c0_24 = arith.constant 0 : index
    %c0_25 = arith.constant 0 : index
    %36 = vector.load %arg9[%c0_24, %c0_25] : memref<1x32xf32, #tpu.memory_space<vmem>>, vector<1x32xf32>
    %37 = vector.broadcast %36 : vector<1x32xf32> to vector<16x32xf32>
    %38 = arith.addf %35, %37 : vector<16x32xf32>
    %39 = math.tanh %38 : vector<16x32xf32>
    %c0_26 = arith.constant 0 : index
    %c0_27 = arith.constant 0 : index
    %c0_28 = arith.constant 0 : index
    %40 = vector.load %arg10[%c0_26, %c0_27, %c0_28] : memref<1x16x32xf32, #tpu.memory_space<vmem>>, vector<1x16x32xf32>
    %41 = vector.shape_cast %40 : vector<1x16x32xf32> to vector<16x32xf32>
    %42 = vector.shape_cast %39 : vector<16x32xf32> to vector<1x16x32xf32>
    tpu.vector_store %arg10[%c0_26, %c0_27, %c0_28], %42 {strides = array<i32>} : memref<1x16x32xf32, #tpu.memory_space<vmem>>, vector<1x16x32xf32>,
    return
  }
  func.func @transform_0(%arg0: i32) -> (i32, i32, i32) {
    %c0_i32 = arith.constant 0 : i32
    %c0_i32_0 = arith.constant 0 : i32
    %c0_i32_1 = arith.constant 0 : i32
    return %arg0, %c0_i32, %c0_i32_0 : i32, i32, i32
  }
  func.func @transform_1(%arg0: i32) -> (i32, i32, i32) {
    %c0_i32 = arith.constant 0 : i32
    %c0_i32_0 = arith.constant 0 : i32
    %c0_i32_1 = arith.constant 0 : i32
    return %arg0, %c0_i32, %c0_i32_0 : i32, i32, i32
  }
  func.func @transform_2(%arg0: i32) -> (i32, i32) {
    %c0_i32 = arith.constant 0 : i32
    %c0_i32_0 = arith.constant 0 : i32
    %c0_i32_1 = arith.constant 0 : i32
    return %c0_i32, %c0_i32_0 : i32, i32
  }
  func.func @transform_3(%arg0: i32) -> (i32, i32) {
    %c0_i32 = arith.constant 0 : i32
    %c0_i32_0 = arith.constant 0 : i32
    %c0_i32_1 = arith.constant 0 : i32
    return %c0_i32, %c0_i32_0 : i32, i32
  }
  func.func @transform_4(%arg0: i32) -> (i32, i32) {
    %c0_i32 = arith.constant 0 : i32
    %c0_i32_0 = arith.constant 0 : i32
    %c0_i32_1 = arith.constant 0 : i32
    return %c0_i32, %c0_i32_0 : i32, i32
  }
  func.func @transform_5(%arg0: i32) -> (i32, i32) {
    %c0_i32 = arith.constant 0 : i32
    %c0_i32_0 = arith.constant 0 : i32
    %c0_i32_1 = arith.constant 0 : i32
    return %c0_i32, %c0_i32_0 : i32, i32
  }
  func.func @transform_6(%arg0: i32) -> (i32, i32) {
    %c0_i32 = arith.constant 0 : i32
    %c0_i32_0 = arith.constant 0 : i32
    %c0_i32_1 = arith.constant 0 : i32
    return %c0_i32, %c0_i32_0 : i32, i32
  }
  func.func @transform_7(%arg0: i32) -> (i32, i32) {
    %c0_i32 = arith.constant 0 : i32
    %c0_i32_0 = arith.constant 0 : i32
    %c0_i32_1 = arith.constant 0 : i32
    return %c0_i32, %c0_i32_0 : i32, i32
  }
  func.func @transform_8(%arg0: i32) -> (i32, i32) {
    %c0_i32 = arith.constant 0 : i32
    %c0_i32_0 = arith.constant 0 : i32
    %c0_i32_1 = arith.constant 0 : i32
    return %c0_i32, %c0_i32_0 : i32, i32
  }
  func.func @transform_9(%arg0: i32) -> (i32, i32, i32) {
    %c0_i32 = arith.constant 0 : i32
    %c0_i32_0 = arith.constant 0 : i32
    %c0_i32_1 = arith.constant 0 : i32
    return %arg0, %c0_i32, %c0_i32_0 : i32, i32, i32
  }
}

module attributes {stable_mosaic.version = 11 : i64} {
  func.func @_post_kernel(%arg0: memref<16x32xf32, #tpu.memory_space<vmem>>, %arg1: memref<16x32xf32, #tpu.memory_space<vmem>>, %arg2: memref<16x32xf32, #tpu.memory_space<vmem>>, %arg3: memref<4x16xf32, #tpu.memory_space<vmem>>, %arg4: memref<4x32xf32, #tpu.memory_space<vmem>>, %arg5: memref<4x32xf32, #tpu.memory_space<vmem>>, %arg6: memref<32x32xf32, #tpu.memory_space<vmem>>, %arg7: memref<1x32xf32, #tpu.memory_space<vmem>>, %arg8: memref<32x32xf32, #tpu.memory_space<vmem>>, %arg9: memref<1x32xf32, #tpu.memory_space<vmem>>, %arg10: memref<32x32xf32, #tpu.memory_space<vmem>>, %arg11: memref<1x32xf32, #tpu.memory_space<vmem>>, %arg12: memref<16x32xf32, #tpu.memory_space<vmem>>, %arg13: memref<16x32xf32, #tpu.memory_space<vmem>>, %arg14: memref<4x32xf32, #tpu.memory_space<vmem>>, %arg15: memref<4x32xf32, #tpu.memory_space<vmem>>) attributes {dimension_semantics = [], scalar_prefetch = 0 : i64, scratch_operands = 0 : i64, tpu.core_type = #tpu.core_type<tc>} {
    %c0 = arith.constant 0 : index
    %c0_0 = arith.constant 0 : index
    %0 = vector.load %arg0[%c0, %c0_0] : memref<16x32xf32, #tpu.memory_space<vmem>>, vector<16x32xf32>
    %cst = arith.constant -1.000000e+01 : f32
    %cst_1 = arith.constant 1.000000e+01 : f32
    %1 = vector.broadcast %cst : f32 to vector<16x32xf32>
    %2 = arith.maximumf %1, %0 : vector<16x32xf32>
    %3 = vector.broadcast %cst_1 : f32 to vector<16x32xf32>
    %4 = arith.minimumf %3, %2 : vector<16x32xf32>
    %c0_2 = arith.constant 0 : index
    %c0_3 = arith.constant 0 : index
    %5 = vector.load %arg6[%c0_2, %c0_3] : memref<32x32xf32, #tpu.memory_space<vmem>>, vector<32x32xf32>
    %6 = arith.truncf %4 : vector<16x32xf32> to vector<16x32xbf16>
    %7 = arith.truncf %5 : vector<32x32xf32> to vector<32x32xbf16>
    %cst_4 = arith.constant dense<0.000000e+00> : vector<16x32xf32>
    %8 = tpu.matmul %6, %7, %cst_4 {dimension_numbers = #tpu.dot_dimension_numbers<[1], [0], [0], [1], [0, 0, 1, 1], [], []>} : vector<16x32xbf16>, vector<32x32xbf16>, vector<16x32xf32> -> vector<16x32xf32>
    %c0_5 = arith.constant 0 : index
    %c0_6 = arith.constant 0 : index
    %9 = vector.load %arg7[%c0_5, %c0_6] : memref<1x32xf32, #tpu.memory_space<vmem>>, vector<1x32xf32>
    %10 = vector.broadcast %9 : vector<1x32xf32> to vector<16x32xf32>
    %11 = arith.addf %8, %10 : vector<16x32xf32>
    %cst_7 = arith.constant 0.000000e+00 : f32
    %12 = vector.broadcast %cst_7 : f32 to vector<16x32xf32>
    %13 = arith.maximumf %11, %12 : vector<16x32xf32>
    %c0_8 = arith.constant 0 : index
    %c0_9 = arith.constant 0 : index
    %14 = vector.load %arg8[%c0_8, %c0_9] : memref<32x32xf32, #tpu.memory_space<vmem>>, vector<32x32xf32>
    %15 = arith.truncf %13 : vector<16x32xf32> to vector<16x32xbf16>
    %16 = arith.truncf %14 : vector<32x32xf32> to vector<32x32xbf16>
    %cst_10 = arith.constant dense<0.000000e+00> : vector<16x32xf32>
    %17 = tpu.matmul %15, %16, %cst_10 {dimension_numbers = #tpu.dot_dimension_numbers<[1], [0], [0], [1], [0, 0, 1, 1], [], []>} : vector<16x32xbf16>, vector<32x32xbf16>, vector<16x32xf32> -> vector<16x32xf32>
    %c0_11 = arith.constant 0 : index
    %c0_12 = arith.constant 0 : index
    %18 = vector.load %arg9[%c0_11, %c0_12] : memref<1x32xf32, #tpu.memory_space<vmem>>, vector<1x32xf32>
    %19 = vector.broadcast %18 : vector<1x32xf32> to vector<16x32xf32>
    %20 = arith.addf %17, %19 : vector<16x32xf32>
    %21 = math.tanh %20 : vector<16x32xf32>
    %c0_13 = arith.constant 0 : index
    %c0_14 = arith.constant 0 : index
    %22 = vector.load %arg12[%c0_13, %c0_14] : memref<16x32xf32, #tpu.memory_space<vmem>>, vector<16x32xf32>
    tpu.vector_store %arg12[%c0_13, %c0_14], %21 {strides = array<i32>} : memref<16x32xf32, #tpu.memory_space<vmem>>, vector<16x32xf32>,
    %c0_15 = arith.constant 0 : index
    %c0_16 = arith.constant 0 : index
    %23 = vector.load %arg1[%c0_15, %c0_16] : memref<16x32xf32, #tpu.memory_space<vmem>>, vector<16x32xf32>
    %c0_17 = arith.constant 0 : index
    %c0_18 = arith.constant 0 : index
    %24 = vector.load %arg10[%c0_17, %c0_18] : memref<32x32xf32, #tpu.memory_space<vmem>>, vector<32x32xf32>
    %25 = arith.truncf %23 : vector<16x32xf32> to vector<16x32xbf16>
    %26 = arith.truncf %24 : vector<32x32xf32> to vector<32x32xbf16>
    %cst_19 = arith.constant dense<0.000000e+00> : vector<16x32xf32>
    %27 = tpu.matmul %25, %26, %cst_19 {dimension_numbers = #tpu.dot_dimension_numbers<[1], [0], [0], [1], [0, 0, 1, 1], [], []>} : vector<16x32xbf16>, vector<32x32xbf16>, vector<16x32xf32> -> vector<16x32xf32>
    %c0_20 = arith.constant 0 : index
    %c0_21 = arith.constant 0 : index
    %28 = vector.load %arg11[%c0_20, %c0_21] : memref<1x32xf32, #tpu.memory_space<vmem>>, vector<1x32xf32>
    %29 = vector.broadcast %28 : vector<1x32xf32> to vector<16x32xf32>
    %30 = arith.addf %27, %29 : vector<16x32xf32>
    %31 = math.tanh %30 : vector<16x32xf32>
    %c0_22 = arith.constant 0 : index
    %c0_23 = arith.constant 0 : index
    %32 = vector.load %arg13[%c0_22, %c0_23] : memref<16x32xf32, #tpu.memory_space<vmem>>, vector<16x32xf32>
    tpu.vector_store %arg13[%c0_22, %c0_23], %31 {strides = array<i32>} : memref<16x32xf32, #tpu.memory_space<vmem>>, vector<16x32xf32>,
    %c0_24 = arith.constant 0 : index
    %c0_25 = arith.constant 0 : index
    %33 = vector.load %arg1[%c0_24, %c0_25] : memref<16x32xf32, #tpu.memory_space<vmem>>, vector<16x32xf32>
    %cst_26 = arith.constant -5.000000e+00 : f32
    %cst_27 = arith.constant 5.000000e+00 : f32
    %34 = vector.broadcast %cst_26 : f32 to vector<16x32xf32>
    %35 = arith.maximumf %34, %33 : vector<16x32xf32>
    %36 = vector.broadcast %cst_27 : f32 to vector<16x32xf32>
    %37 = arith.minimumf %36, %35 : vector<16x32xf32>
    %c0_28 = arith.constant 0 : index
    %c0_29 = arith.constant 0 : index
    %38 = vector.load %arg2[%c0_28, %c0_29] : memref<16x32xf32, #tpu.memory_space<vmem>>, vector<16x32xf32>
    %cst_30 = arith.constant -5.000000e+00 : f32
    %cst_31 = arith.constant 5.000000e+00 : f32
    %39 = vector.broadcast %cst_30 : f32 to vector<16x32xf32>
    %40 = arith.maximumf %39, %38 : vector<16x32xf32>
    %41 = vector.broadcast %cst_31 : f32 to vector<16x32xf32>
    %42 = arith.minimumf %41, %40 : vector<16x32xf32>
    %c0_32 = arith.constant 0 : index
    %c0_33 = arith.constant 0 : index
    %43 = vector.load %arg4[%c0_32, %c0_33] : memref<4x32xf32, #tpu.memory_space<vmem>>, vector<4x32xf32>
    %cst_34 = arith.constant -5.000000e+00 : f32
    %cst_35 = arith.constant 5.000000e+00 : f32
    %44 = vector.broadcast %cst_34 : f32 to vector<4x32xf32>
    %45 = arith.maximumf %44, %43 : vector<4x32xf32>
    %46 = vector.broadcast %cst_35 : f32 to vector<4x32xf32>
    %47 = arith.minimumf %46, %45 : vector<4x32xf32>
    %c0_36 = arith.constant 0 : index
    %c0_37 = arith.constant 0 : index
    %48 = vector.load %arg3[%c0_36, %c0_37] : memref<4x16xf32, #tpu.memory_space<vmem>>, vector<4x16xf32>
    %49 = arith.truncf %48 : vector<4x16xf32> to vector<4x16xbf16>
    %50 = arith.truncf %37 : vector<16x32xf32> to vector<16x32xbf16>
    %cst_38 = arith.constant dense<0.000000e+00> : vector<4x32xf32>
    %51 = tpu.matmul %49, %50, %cst_38 {dimension_numbers = #tpu.dot_dimension_numbers<[1], [0], [0], [1], [0, 0, 1, 1], [], []>} : vector<4x16xbf16>, vector<16x32xbf16>, vector<4x32xf32> -> vector<4x32xf32>
    %cst_39 = arith.constant 5.000000e-01 : f32
    %52 = vector.broadcast %cst_39 : f32 to vector<4x32xf32>
    %53 = arith.mulf %52, %51 : vector<4x32xf32>
    %54 = arith.addf %47, %53 : vector<4x32xf32>
    %c0_40 = arith.constant 0 : index
    %c0_41 = arith.constant 0 : index
    %55 = vector.load %arg14[%c0_40, %c0_41] : memref<4x32xf32, #tpu.memory_space<vmem>>, vector<4x32xf32>
    tpu.vector_store %arg14[%c0_40, %c0_41], %54 {strides = array<i32>} : memref<4x32xf32, #tpu.memory_space<vmem>>, vector<4x32xf32>,
    %c0_42 = arith.constant 0 : index
    %c0_43 = arith.constant 0 : index
    %56 = vector.load %arg5[%c0_42, %c0_43] : memref<4x32xf32, #tpu.memory_space<vmem>>, vector<4x32xf32>
    %cst_44 = arith.constant -5.000000e+00 : f32
    %cst_45 = arith.constant 5.000000e+00 : f32
    %57 = vector.broadcast %cst_44 : f32 to vector<4x32xf32>
    %58 = arith.maximumf %57, %56 : vector<4x32xf32>
    %59 = vector.broadcast %cst_45 : f32 to vector<4x32xf32>
    %60 = arith.minimumf %59, %58 : vector<4x32xf32>
    %c0_46 = arith.constant 0 : index
    %c0_47 = arith.constant 0 : index
    %61 = vector.load %arg3[%c0_46, %c0_47] : memref<4x16xf32, #tpu.memory_space<vmem>>, vector<4x16xf32>
    %62 = arith.truncf %61 : vector<4x16xf32> to vector<4x16xbf16>
    %63 = arith.truncf %42 : vector<16x32xf32> to vector<16x32xbf16>
    %cst_48 = arith.constant dense<0.000000e+00> : vector<4x32xf32>
    %64 = tpu.matmul %62, %63, %cst_48 {dimension_numbers = #tpu.dot_dimension_numbers<[1], [0], [0], [1], [0, 0, 1, 1], [], []>} : vector<4x16xbf16>, vector<16x32xbf16>, vector<4x32xf32> -> vector<4x32xf32>
    %cst_49 = arith.constant 5.000000e-01 : f32
    %65 = vector.broadcast %cst_49 : f32 to vector<4x32xf32>
    %66 = arith.mulf %65, %64 : vector<4x32xf32>
    %67 = arith.addf %60, %66 : vector<4x32xf32>
    %c0_50 = arith.constant 0 : index
    %c0_51 = arith.constant 0 : index
    %68 = vector.load %arg15[%c0_50, %c0_51] : memref<4x32xf32, #tpu.memory_space<vmem>>, vector<4x32xf32>
    tpu.vector_store %arg15[%c0_50, %c0_51], %67 {strides = array<i32>} : memref<4x32xf32, #tpu.memory_space<vmem>>, vector<4x32xf32>,
    return
  }
}

</mosaic_0001>

<bundles_post_ra>
// kernel: temporal_mscia_forward.5
= control target key start
LH: loop header
LB: loop body
LE: loop exit
PB: predicated region body
PF: predicated region fallthrough
CT: control target
= control target key end

     0   :  { %10 = vsyncpa [#allocation4], 0  ;;  %s716_s0 = inlined_call_operand.vmem [shape: f32[16,16], index: 0, kind: input, shape index: {}]   ;;  %s717_s1 = inlined_call_operand.vmem [shape: f32[16,16], index: 1, kind: input, shape index: {}]   ;;  %s718_s2 = inlined_call_operand.vmem [shape: f32[16], index: 2, kind: input, shape index: {}]   ;;  %s719_s3 = inlined_call_operand.<no memory space> [shape: f32[1], index: 3, kind: input, shape index: {}]   ;;  %s720_s4 = inlined_call_operand.vmem [shape: f32[16,16], index: 4, kind: output, shape index: {}]  }
   0x1   :  { %s21_s17 = sshll.u32 %s718_s2, 4  ;;  %s22_s17 = int_to_ptr.vmem [resolvable:$true] %s21_s17 }
   0x2   :  { %s495_s18 = scalar_lea.vmem %s22_s17, 16  ;;  %p500_p1 = scmp.lt.s32.totalorder %s22_s17, %s22_s17 }
   0x3   :  { %p496_p0 = scmp.ne.s32.totalorder %s22_s17, %s495_s18  ;;  %p501_p2 = scmp.lt.s32.totalorder %s495_s18, %s495_s18 }
   0x5   :  { %p502_p3 = por %p501_p2, %p500_p1 }
   0x7   :  { %p503_p4 = pnand %p502_p3, %p496_p0 }
   0x9   :  { %506 = shalt.err (!%p503_p4)
}
   0xa   :  { %s509_s19 = smov [#allocation3]  }
   0xb   :  { %24 = dma.vmem_to_smem %s22_s17, 16, %s509_s19, [#allocation4]  }
   0xc   :  { %507 = dma.done.wait [#allocation4], 16  }
   0xd   :  { %508 = vsyncadd [#allocation4], 4294967280 }
   0xe   :  { %30 = sfence }
   0xf   :  { %v557_v0 = vld [vmem:[%s716_s0] sm:$0xff]  ;;  %v510_v1 = vmov 1   ;;  %v511_v2 = vmov 0   ;;  %v564_v3 = vld [vmem:[%s716_s0 + $0x8] sm:$0xff]  ;;  %v512_v4 = vmov 2   ;;  %v513_v5 = vmov 3  }
  0x10   :  { %466 = vset.pattern.permute.xlu1 %v510_v1  ;;  %465 = vset.pattern.permute.xlu0 %v511_v2  ;;  %v514_v6 = vmov 4   ;;  %v515_v7 = vmov 5   ;;  %v516_v8 = vmov 6   ;;  %v517_v9 = vmov 8   ;;  %v418_v31 = vld [vmem:[%s717_s1 + $0x1] ss:$0 sm:$0xff] }
  0x11   :  { %60 = vperm.xlu1 %466, %v557_v0   ;;  %36 = vperm.xlu0 %465, %v557_v0   ;;  %v518_v10 = vmov 9   ;;  %v519_v11 = vmov 7   ;;  %v520_v12 = vmov 11   ;;  %v521_v13 = vmov 12   ;;  %s605_s24 = sld [smem:[#allocation3 + $0x1]]  ;;  %s610_s27 = sld [smem:[#allocation3]] }
  0x12   :  { %v522_v14 = vmov 14   ;;  %v523_v15 = vmov 15   ;;  %v524_v16 = vmov 10   ;;  %v525_v17 = vmov 13   ;;  %v417_v32 = vld [vmem:[%s717_s1] ss:$0 sm:$0xff] }
  0x13   :  { %v420_v33 = vld [vmem:[%s717_s1 + $0x2] ss:$0 sm:$0xff]  ;;  %s615_s30 = sld [smem:[#allocation3 + $0x2]]  ;;  %v422_v40 = vld [vmem:[%s717_s1 + $0x3] ss:$0 sm:$0xff]  ;;  %s622_s7 = sld [smem:[#allocation3 + $0x3]] }
  0x14   :  { %s624_s8 = sld [smem:[#allocation3 + $0x4]]  ;;  %v424_v47 = vld [vmem:[%s717_s1 + $0x4] ss:$0 sm:$0xff]  ;;  %s633_s11 = sld [smem:[#allocation3 + $0x5]]  ;;  %v426_v59 = vld [vmem:[%s717_s1 + $0x5] ss:$0 sm:$0xff] }
  0x15   :  { %64 = vperm.xlu1 %466, %v564_v3   ;;  %41 = vperm.xlu0 %465, %v564_v3   ;;  %s643_s16 = sld [smem:[#allocation3 + $0x6]]  ;;  %s645_s17 = sld [smem:[#allocation3 + $0x7]]  ;;  %vm409_vm0 = vcmask 130048  }
  0x16   :  { %s653_s20 = sld [smem:[#allocation3 + $0x8]]  ;;  %s665_s23 = sld [smem:[#allocation3 + $0x9]] }
  0x17   :  { %v76_v52 = vstv %s605_s24  ;;  %v53_v53 = vstv %s610_s27  ;;  %s668_s24 = sld [smem:[#allocation3 + $0xa]]  ;;  %s678_s29 = sld [smem:[#allocation3 + $0xb]] }
  0x18   :  { %s684_s6 = sld [smem:[#allocation3 + $0xc]]  ;;  %s690_s9 = sld [smem:[#allocation3 + $0xd]] }
  0x19   :  { %468 = vset.pattern.permute.xlu1 %v512_v4  ;;  %467 = vset.pattern.permute.xlu0 %v512_v4  ;;  %v99_v56 = vstv %s615_s30  ;;  %s696_s12 = sld [smem:[#allocation3 + $0xf]]  ;;  %s701_s15 = sld [smem:[#allocation3 + $0xe]] }
  0x1a   :  { %87 = vperm.xlu1 %468, %v564_v3   ;;  %83 = vperm.xlu0 %467, %v557_v0  }
  0x1e   :  { %469 = vset.pattern.permute.xlu1 %v513_v5  ;;  %470 = vset.pattern.permute.xlu0 %v513_v5  ;;  %v428_v5 = vld [vmem:[%s717_s1 + $0x6] ss:$0 sm:$0xff] }
  0x1f   :  { %106 = vperm.xlu1 %469, %v557_v0   ;;  %110 = vperm.xlu0 %470, %v564_v3  }
  0x23   :  { %471 = vset.pattern.permute.xlu1 %v514_v6  ;;  %472 = vset.pattern.permute.xlu0 %v515_v7 }
  0x24   :  { %129 = vperm.xlu1 %471, %v557_v0   ;;  %152 = vperm.xlu0 %472, %v557_v0  }
  0x28   :  { %133 = vperm.xlu1 %471, %v564_v3   ;;  %475 = vset.pattern.permute.xlu0 %v516_v8 }
  0x29   :  { %179 = vperm.xlu0 %475, %v564_v3  }
  0x2c   :  { %473 = vset.pattern.permute.xlu1 %v515_v7 }
  0x2d   :  { %156 = vperm.xlu1 %473, %v564_v3   ;;  %477 = vset.pattern.permute.xlu0 %v517_v9 }
  0x2e   :  { %221 = vperm.xlu0 %477, %v557_v0  }
  0x31   :  { %474 = vset.pattern.permute.xlu1 %v516_v8 }
  0x32   :  { %175 = vperm.xlu1 %474, %v557_v0   ;;  %480 = vset.pattern.permute.xlu0 %v518_v10 }
  0x33   :  { %248 = vperm.xlu0 %480, %v564_v3  }
  0x36   :  { %476 = vset.pattern.permute.xlu1 %v519_v11 }
  0x37   :  { %198 = vperm.xlu1 %476, %v557_v0   ;;  %482 = vset.pattern.permute.xlu0 %v520_v12 }
  0x38   :  { %290 = vperm.xlu0 %482, %v557_v0  }
  0x3b   :  { %202 = vperm.xlu1 %476, %v564_v3  }
  0x3c   :  { %485 = vset.pattern.permute.xlu0 %v521_v13 }
  0x3d   :  { %317 = vperm.xlu0 %485, %v564_v3  }
  0x3f   :  { %478 = vset.pattern.permute.xlu1 %v517_v9 }
  0x40   :  { %225 = vperm.xlu1 %478, %v564_v3  }
  0x41   :  { %487 = vset.pattern.permute.xlu0 %v522_v14 }
  0x42   :  { %359 = vperm.xlu0 %487, %v557_v0  }
  0x44   :  { %479 = vset.pattern.permute.xlu1 %v518_v10  ;;  %v145_v10 = vstv %s624_s8 }
  0x45   :  { %244 = vperm.xlu1 %479, %v557_v0  }
  0x46   :  { %490 = vset.pattern.permute.xlu0 %v523_v15 }
  0x47   :  { %386 = vperm.xlu0 %490, %v564_v3  }
  0x49   :  { %481 = vset.pattern.permute.xlu1 %v524_v16 }
  0x4a   :  { %267 = vperm.xlu1 %481, %v557_v0  }
  0x4e   :  { %271 = vperm.xlu1 %481, %v564_v3  }
  0x52   :  { %483 = vset.pattern.permute.xlu1 %v520_v12 }
  0x53   :  { %294 = vperm.xlu1 %483, %v564_v3  }
  0x57   :  { %484 = vset.pattern.permute.xlu1 %v521_v13 }
  0x58   :  { %313 = vperm.xlu1 %484, %v557_v0  }
  0x5c   :  { %486 = vset.pattern.permute.xlu1 %v525_v17 }
  0x5d   :  { %336 = vperm.xlu1 %486, %v557_v0  }
  0x61   :  { %340 = vperm.xlu1 %486, %v564_v3  }
  0x65   :  { %488 = vset.pattern.permute.xlu1 %v522_v14 }
  0x66   :  { %363 = vperm.xlu1 %488, %v564_v3   ;;  %v122_v3 = vstv %s622_s7 }
  0x6a   :  { %489 = vset.pattern.permute.xlu1 %v523_v15 }
  0x6b   :  { %382 = vperm.xlu1 %489, %v557_v0  }
  0x90   :  { %v61_v18 = vpop.permute.xlu1 %60  ;;  %v37_v25 = vpop.permute.xlu0 %36 }
  0x91   :  { %v71_v38 = vadd.f32 %v418_v31, %v61_v18  ;;  %v48_v39 = vadd.f32 %v417_v32, %v37_v25  ;;  %v430_v18 = vld [vmem:[%s717_s1 + $0x7] ss:$0 sm:$0xff] }
  0x93   :  { %v73_v49 = vmax.f32 %v71_v38, 0.0  ;;  %v50_v50 = vmax.f32 %v48_v39, 0.0 }
  0x94   :  { %v65_v19 = vpop.permute.xlu1 %64  ;;  %v42_v27 = vpop.permute.xlu0 %41 }
  0x95   :  { %v72_v36 = vadd.f32 %v418_v31, %v65_v19  ;;  %v49_v37 = vadd.f32 %v417_v32, %v42_v27  ;;  %v77_v1 = vmul.f32 %v76_v52, %v73_v49  ;;  %v54_v2 = vmul.f32 %v53_v53, %v50_v50 }
  0x97   :  { %v74_v44 = vmax.f32 %v72_v36, 0.0  ;;  %v51_v45 = vmax.f32 %v49_v37, 0.0  ;;  %v79_v19 = vadd.f32 %v77_v1, %v54_v2  ;;  %v438_v1 = vld [vmem:[%s717_s1 + $0xb] ss:$0 sm:$0xff] }
  0x99   :  { %v88_v20 = vpop.permute.xlu1 %87  ;;  %v84_v29 = vpop.permute.xlu0 %83  ;;  %v78_v61 = vmul.f32 %v76_v52, %v74_v44  ;;  %v55_v62 = vmul.f32 %v53_v53, %v51_v45 }
  0x9a   :  { %v95_v41 = vadd.f32 %v420_v33, %v88_v20  ;;  %v94_v42 = vadd.f32 %v420_v33, %v84_v29 }
  0x9b   :  { %v80_v14 = vadd.f32 %v78_v61, %v55_v62 }
  0x9c   :  { %v97_v54 = vmax.f32 %v95_v41, 0.0  ;;  %v96_v57 = vmax.f32 %v94_v42, 0.0  ;;  %v191_v41 = vstv %s643_s16 }
  0x9e   :  { %v107_v21 = vpop.permute.xlu1 %106  ;;  %v111_v34 = vpop.permute.xlu0 %110  ;;  %v101_v7 = vmul.f32 %v99_v56, %v97_v54  ;;  %v100_v9 = vmul.f32 %v99_v56, %v96_v57 }
  0x9f   :  { %v118_v46 = vadd.f32 %v422_v40, %v111_v34  ;;  %v117_v51 = vadd.f32 %v422_v40, %v107_v21  ;;  %v432_v34 = vld [vmem:[%s717_s1 + $0x8] ss:$0 sm:$0xff] }
  0xa0   :  { %v102_v29 = vadd.f32 %v100_v9, %v79_v19  ;;  %v260_v9 = vstv %s665_s23 }
  0xa1   :  { %v120_v63 = vmax.f32 %v118_v46, 0.0  ;;  %v119_v4 = vmax.f32 %v117_v51, 0.0 }
  0xa3   :  { %v130_v22 = vpop.permute.xlu1 %129  ;;  %v153_v43 = vpop.permute.xlu0 %152  ;;  %v124_v15 = vmul.f32 %v122_v3, %v120_v63  ;;  %v123_v20 = vmul.f32 %v122_v3, %v119_v4 }
  0xa4   :  { %v140_v58 = vadd.f32 %v424_v47, %v130_v22  ;;  %v163_v12 = vadd.f32 %v426_v59, %v153_v43  ;;  %v214_v43 = vstv %s645_s17 }
  0xa5   :  { %v125_v40 = vadd.f32 %v123_v20, %v102_v29 }
  0xa6   :  { %v142_v11 = vmax.f32 %v140_v58, 0.0  ;;  %v165_v32 = vmax.f32 %v163_v12, 0.0  ;;  %v237_v58 = vstv %s653_s20 }
  0xa7   :  { %v134_v23 = vpop.permute.xlu1 %133 }
  0xa8   :  { %v141_v55 = vadd.f32 %v424_v47, %v134_v23  ;;  %v180_v60 = vpop.permute.xlu0 %179  ;;  %v103_v23 = vadd.f32 %v101_v7, %v80_v14  ;;  %v146_v31 = vmul.f32 %v145_v10, %v142_v11 }
  0xa9   :  { %v187_v17 = vadd.f32 %v428_v5, %v180_v60 }
  0xaa   :  { %v143_v8 = vmax.f32 %v141_v55, 0.0  ;;  %v126_v36 = vadd.f32 %v124_v15, %v103_v23  ;;  %v148_v46 = vadd.f32 %v146_v31, %v125_v40  ;;  %v436_v55 = vld [vmem:[%s717_s1 + $0xa] ss:$0 sm:$0xff]  ;;  %v442_v23 = vld [vmem:[%s717_s1 + $0xd] ss:$0 sm:$0xff] }
  0xab   :  { %v189_v38 = vmax.f32 %v187_v17, 0.0 }
  0xac   :  { %v157_v24 = vpop.permute.xlu1 %156  ;;  %v147_v25 = vmul.f32 %v145_v10, %v143_v8 }
  0xad   :  { %v164_v0 = vadd.f32 %v426_v59, %v157_v24  ;;  %v222_v13 = vpop.permute.xlu0 %221  ;;  %v168_v24 = vstv %s633_s11  ;;  %v193_v52 = vmul.f32 %v191_v41, %v189_v38 }
  0xae   :  { %v169_v47 = vmul.f32 %v168_v24, %v165_v32  ;;  %v232_v50 = vadd.f32 %v432_v34, %v222_v13 }
  0xaf   :  { %v166_v16 = vmax.f32 %v164_v0, 0.0 }
  0xb0   :  { %v171_v61 = vadd.f32 %v169_v47, %v148_v46  ;;  %v234_v63 = vmax.f32 %v232_v50, 0.0 }
  0xb1   :  { %v596_v26 = vpop.permute.xlu1 %175  ;;  %v170_v37 = vmul.f32 %v168_v24, %v166_v16  ;;  %v283_v16 = vstv %s668_s24 }
  0xb2   :  { %v186_v21 = vadd.f32 %v428_v5, %v596_v26  ;;  %v249_v26 = vpop.permute.xlu0 %248  ;;  %v238_v15 = vmul.f32 %v237_v58, %v234_v63  ;;  %v398_v63 = vstv %s696_s12 }
  0xb4   :  { %v188_v42 = vmax.f32 %v186_v21, 0.0 }
  0xb6   :  { %v598_v28 = vpop.permute.xlu1 %198  ;;  %v192_v56 = vmul.f32 %v191_v41, %v188_v42  ;;  %v444_v41 = vld [vmem:[%s717_s1 + $0xe] ss:$0 sm:$0xff] }
  0xb7   :  { %v209_v33 = vadd.f32 %v430_v18, %v598_v28  ;;  %v149_v28 = vadd.f32 %v147_v25, %v126_v36  ;;  %v446_v36 = vld [vmem:[%s717_s1 + $0xf] ss:$0 sm:$0xff] }
  0xb8   :  { %v194_v8 = vadd.f32 %v192_v56, %v171_v61 }
  0xb9   :  { %v211_v49 = vmax.f32 %v209_v33, 0.0  ;;  %v172_v51 = vadd.f32 %v170_v37, %v149_v28  ;;  %v329_v28 = vstv %s684_s6 }
  0xba   :  { %v600_v30 = vpop.permute.xlu1 %202 }
  0xbb   :  { %v210_v27 = vadd.f32 %v430_v18, %v600_v30  ;;  %v434_v30 = vld [vmem:[%s717_s1 + $0x9] ss:$0 sm:$0xff]  ;;  %v215_v62 = vmul.f32 %v214_v43, %v211_v49  ;;  %v195_v4 = vadd.f32 %v193_v52, %v172_v51 }
  0xbc   :  { %v256_v54 = vadd.f32 %v434_v30, %v249_v26 }
  0xbd   :  { %v212_v44 = vmax.f32 %v210_v27, 0.0  ;;  %v217_v14 = vadd.f32 %v215_v62, %v194_v8 }
  0xbf   :  { %v617_v35 = vpop.permute.xlu1 %225  ;;  %v216_v59 = vmul.f32 %v214_v43, %v212_v44  ;;  %v240_v32 = vadd.f32 %v238_v15, %v217_v14 }
  0xc0   :  { %v233_v39 = vadd.f32 %v432_v34, %v617_v35  ;;  %v291_v35 = vpop.permute.xlu0 %290  ;;  %v306_v34 = vstv %s678_s29 }
  0xc1   :  { %v218_v11 = vadd.f32 %v216_v59, %v195_v4  ;;  %v301_v12 = vadd.f32 %v438_v1, %v291_v35 }
  0xc2   :  { %v235_v53 = vmax.f32 %v233_v39, 0.0 }
  0xc3   :  { %v303_v29 = vmax.f32 %v301_v12, 0.0 }
  0xc4   :  { %v629_v48 = vpop.permute.xlu1 %244  ;;  %v318_v2 = vpop.permute.xlu0 %317  ;;  %v239_v5 = vmul.f32 %v237_v58, %v235_v53 }
  0xc5   :  { %v255_v57 = vadd.f32 %v434_v30, %v629_v48  ;;  %v258_v48 = vmax.f32 %v256_v54, 0.0  ;;  %v352_v54 = vstv %s690_s9 }
  0xc6   :  { %v241_v19 = vadd.f32 %v239_v5, %v218_v11  ;;  %v404_v11 = vstv %s719_s3 }
  0xc7   :  { %v257_v10 = vmax.f32 %v255_v57, 0.0  ;;  %v262_v20 = vmul.f32 %v260_v9, %v258_v48 }
  0xc8   :  { %v360_v18 = vpop.permute.xlu0 %359 }
  0xc9   :  { %v268_v6 = vpop.permute.xlu1 %267  ;;  %v261_v25 = vmul.f32 %v260_v9, %v257_v10  ;;  %v264_v38 = vadd.f32 %v262_v20, %v241_v19  ;;  %v370_v35 = vadd.f32 %v444_v41, %v360_v18 }
  0xca   :  { %v278_v0 = vadd.f32 %v436_v55, %v268_v6  ;;  %v440_v6 = vld [vmem:[%s717_s1 + $0xc] ss:$0 sm:$0xff] }
  0xcb   :  { %v263_v30 = vadd.f32 %v261_v25, %v240_v32  ;;  %v372_v62 = vmax.f32 %v370_v35, 0.0 }
  0xcc   :  { %v280_v17 = vmax.f32 %v278_v0, 0.0  ;;  %v387_v37 = vpop.permute.xlu0 %386 }
  0xcd   :  { %v272_v22 = vpop.permute.xlu1 %271  ;;  %v394_v47 = vadd.f32 %v446_v36, %v387_v37 }
  0xce   :  { %v279_v60 = vadd.f32 %v436_v55, %v272_v22  ;;  %v325_v22 = vadd.f32 %v440_v6, %v318_v2  ;;  %v284_v33 = vmul.f32 %v283_v16, %v280_v17 }
  0xcf   :  { %v396_v59 = vmax.f32 %v394_v47, 0.0 }
  0xd0   :  { %v281_v13 = vmax.f32 %v279_v60, 0.0  ;;  %v327_v40 = vmax.f32 %v325_v22, 0.0  ;;  %v286_v49 = vadd.f32 %v284_v33, %v263_v30 }
  0xd1   :  { %v400_v48 = vmul.f32 %v398_v63, %v396_v59 }
  0xd2   :  { %v295_v45 = vpop.permute.xlu1 %294  ;;  %v285_v31 = vmul.f32 %v283_v16, %v281_v13  ;;  %v331_v53 = vmul.f32 %v329_v28, %v327_v40 }
  0xd3   :  { %v302_v7 = vadd.f32 %v438_v1, %v295_v45  ;;  %v307_v45 = vmul.f32 %v306_v34, %v303_v29  ;;  %v375_v1 = vstv %s701_s15 }
  0xd4   :  { %v287_v46 = vadd.f32 %v285_v31, %v264_v38  ;;  %v376_v9 = vmul.f32 %v375_v1, %v372_v62 }
  0xd5   :  { %v304_v21 = vmax.f32 %v302_v7, 0.0  ;;  %v309_v60 = vadd.f32 %v307_v45, %v286_v49 }
  0xd7   :  { %v314_v3 = vpop.permute.xlu1 %313  ;;  %v308_v39 = vmul.f32 %v306_v34, %v304_v21 }
  0xd8   :  { %v324_v27 = vadd.f32 %v440_v6, %v314_v3 }
  0xd9   :  { %v310_v52 = vadd.f32 %v308_v39, %v287_v46 }
  0xda   :  { %v326_v43 = vmax.f32 %v324_v27, 0.0 }
  0xdb   :  { %v333_v0 = vadd.f32 %v331_v53, %v310_v52 }
  0xdc   :  { %v337_v24 = vpop.permute.xlu1 %336  ;;  %v330_v55 = vmul.f32 %v329_v28, %v326_v43 }
  0xdd   :  { %v347_v26 = vadd.f32 %v442_v23, %v337_v24 }
  0xde   :  { %v332_v3 = vadd.f32 %v330_v55, %v309_v60 }
  0xdf   :  { %v349_v50 = vmax.f32 %v347_v26, 0.0 }
  0xe0   :  { %v341_v42 = vpop.permute.xlu1 %340 }
  0xe1   :  { %v348_v44 = vadd.f32 %v442_v23, %v341_v42  ;;  %v353_v61 = vmul.f32 %v352_v54, %v349_v50 }
  0xe3   :  { %v350_v51 = vmax.f32 %v348_v44, 0.0  ;;  %v355_v8 = vadd.f32 %v353_v61, %v332_v3 }
  0xe5   :  { %v364_v56 = vpop.permute.xlu1 %363  ;;  %v354_v57 = vmul.f32 %v352_v54, %v350_v51  ;;  %v378_v14 = vadd.f32 %v376_v9, %v355_v8 }
  0xe6   :  { %v371_v58 = vadd.f32 %v444_v41, %v364_v56 }
  0xe7   :  { %v356_v4 = vadd.f32 %v354_v57, %v333_v0 }
  0xe8   :  { %v373_v2 = vmax.f32 %v371_v58, 0.0 }
  0xea   :  { %v377_v5 = vmul.f32 %v375_v1, %v373_v2  ;;  %v383_v7 = vpop.permute.xlu1 %382 }
  0xeb   :  { %v393_v10 = vadd.f32 %v446_v36, %v383_v7 }
  0xec   :  { %v379_v6 = vadd.f32 %v377_v5, %v356_v4 }
  0xed   :  { %v395_v12 = vmax.f32 %v393_v10, 0.0 }
  0xee   :  { %v402_v13 = vadd.f32 %v400_v48, %v379_v6 }
  0xef   :  { %v399_v15 = vmul.f32 %v398_v63, %v395_v12 }
  0xf0   :  { %v406_v16 = vadd.f32 %v404_v11, %v402_v13 }
  0xf1   :  { %v401_v17 = vadd.f32 %v399_v15, %v378_v14 }
  0xf2   :  { %491 = vtanh.f32 %v406_v16 }
  0xf3   :  { %v405_v18 = vadd.f32 %v404_v11, %v401_v17 }
  0xf5   :  { %493 = vtanh.f32 %v405_v18 }
  0xfc   :  { %v492_v19 = vpop.eup %491 }
  0xfd   :  { %411 = vst.msk [vmem:[%s720_s4 + $0x8] sm:$0xff] %vm409_vm0, %v492_v19 }
  0xff   :  { %v494_v20 = vpop.eup %493 }
 0x100   :  { %410 = vst.msk [vmem:[%s720_s4] sm:$0xff] %vm409_vm0, %v494_v20 }
 0x101   :  { %416 = vsyncpa [#allocation4], 1 }

// kernel: temporal_mscia_forward.4
= control target key start
LH: loop header
LB: loop body
LE: loop exit
PB: predicated region body
PF: predicated region fallthrough
CT: control target
= control target key end

     0   :  { %v561_v0 = vmov 0.0   ;;  %vm562_vm0 = vmmov 0   ;;  %vm60_vm1 = vcmask 130048   ;;  %vm107_vm2 = vcmask 261120   ;;  %s782_s2 = inlined_call_operand.vmem [shape: f32[16,32], index: 2, kind: input, shape index: {}]   ;;  %s783_s0 = inlined_call_operand.vmem [shape: f32[16,16], index: 0, kind: input, shape index: {}]   ;;  %s784_s4 = inlined_call_operand.vmem [shape: f32[32,32], index: 4, kind: input, shape index: {}]   ;;  %s785_s3 = inlined_call_operand.vmem [shape: f32[1,32], index: 3, kind: input, shape index: {}]   ;;  %s786_s13 = inlined_call_operand.vmem [shape: f32[16,32], index: 13, kind: output, shape index: {0}]   ;;  %s787_s6 = inlined_call_operand.vmem [shape: f32[32,32], index: 6, kind: input, shape index: {}]   ;;  %s788_s5 = inlined_call_operand.vmem [shape: f32[1,32], index: 5, kind: input, shape index: {}]   ;;  %s789_s7 = inlined_call_operand.vmem [shape: f32[1,32], index: 7, kind: input, shape index: {}]   ;;  %s790_s1 = inlined_call_operand.vmem [shape: f32[16,16], index: 1, kind: input, shape index: {}]   ;;  %s791_s8 = inlined_call_operand.vmem [shape: f32[32,32], index: 8, kind: input, shape index: {}]   ;;  %s792_s10 = inlined_call_operand.vmem [shape: f32[32,16], index: 10, kind: input, shape index: {}]   ;;  %s793_s11 = inlined_call_operand.vmem [shape: f32[32,16], index: 11, kind: input, shape index: {}]   ;;  %s794_s9 = inlined_call_operand.vmem [shape: f32[1,32], index: 9, kind: input, shape index: {}]   ;;  %s795_s12 = inlined_call_operand.vmem [shape: f32[1,16], index: 12, kind: input, shape index: {}]   ;;  %s796_s14 = inlined_call_operand.vmem [shape: f32[16,16], index: 14, kind: output, shape index: {1}]  }
   0x1   :  { %503 = vmatprep.subr.bf16.mxu0 %v561_v0  ;;  %v49_v1 = vld [vmem:[%s782_s2] sm:$0xff]  ;;  %v50_v2 = vld [vmem:[%s782_s2 + $0x8] sm:$0xff]  ;;  %505 = vmatprep.mubr.msk.bf16.mxu0 %vm562_vm0, %v561_v0  ;;  %v116_v10 = vld [vmem:[%s784_s4 + $0x10] sm:$0xff] }
   0x2   :  { %v47_v3 = vld [vmem:[%s783_s0] sm:$0xff]  ;;  %v52_v4 = vpack.c.bf16 %v50_v2, %v49_v1  ;;  %v48_v5 = vld [vmem:[%s783_s0 + $0x8] sm:$0xff]  ;;  %509 = vmatprep.subr.bf16.mxu1 %v561_v0  ;;  %513 = vmatprep.mubr.msk.bf16.mxu1 %vm562_vm0, %v561_v0  ;;  %v117_v11 = vld [vmem:[%s784_s4 + $0x18] sm:$0xff] }
   0x3   :  { %v51_v6 = vpack.c.bf16 %v48_v5, %v47_v3  ;;  %v114_v7 = vld [vmem:[%s784_s4] sm:$0xff]  ;;  %v115_v8 = vld [vmem:[%s784_s4 + $0x8] sm:$0xff]  ;;  %v120_v12 = vpack.c.bf16 %v117_v11, %v116_v10  ;;  %v176_v28 = vld [vmem:[%s787_s6 + $0x10] sm:$0xff] }
   0x4   :  { %504 = vmatpush3.bf16.msra.mxu0 %v52_v4  ;;  %v119_v9 = vpack.c.bf16 %v115_v8, %v114_v7  ;;  %v471_v13 = vld [vmem:[%s785_s3] ss:$0 sm:$0xff]  ;;  %v175_v26 = vld [vmem:[%s787_s6 + $0x8] sm:$0xff]  ;;  %v177_v29 = vld [vmem:[%s787_s6 + $0x18] sm:$0xff] }
   0x5   :  { %517 = vmatprep.subr.bf16.mxu0 %v561_v0  ;;  %v174_v25 = vld [vmem:[%s787_s6] sm:$0xff]  ;;  %v180_v30 = vpack.c.bf16 %v177_v29, %v176_v28  ;;  %v235_v51 = vld [vmem:[%s790_s1 + $0x8] sm:$0xff]  ;;  %v286_v57 = vld [vmem:[%s791_s8 + $0x10] sm:$0xff] }
   0x6   :  { %510 = vmatpush3.bf16.msra.mxu1 %v119_v9  ;;  %v179_v27 = vpack.c.bf16 %v175_v26, %v174_v25  ;;  %v475_v31 = vld [vmem:[%s788_s5] ss:$0 sm:$0xff]  ;;  %v285_v55 = vld [vmem:[%s791_s8 + $0x8] sm:$0xff]  ;;  %v287_v58 = vld [vmem:[%s791_s8 + $0x18] sm:$0xff] }
   0x7   :  { %506 = vmatmul.mubr.msk.bf16.vlgmr.msra.gmra.mrb[0].mxu0 %vm60_vm1, %v51_v6  ;;  %511 = vmatprep.subr.bf16.mxu1 %v561_v0  ;;  %v477_v41 = vld [vmem:[%s789_s7] ss:$0 sm:$0xff]  ;;  %v290_v59 = vpack.c.bf16 %v287_v58, %v286_v57  ;;  %v406_v5 = vld [vmem:[%s792_s10 + $0x8] sm:$0xff]  ;;  %v407_v7 = vld [vmem:[%s792_s10 + $0x10] sm:$0xff] }
   0x8   :  { %521 = vmatprep.mubr.msk.bf16.mxu0 %vm562_vm0, %v561_v0  ;;  %518 = vmatpush3.bf16.msra.mxu0 %v179_v27  ;;  %v234_v50 = vld [vmem:[%s790_s1] sm:$0xff]  ;;  %v408_v8 = vld [vmem:[%s792_s10 + $0x18] sm:$0xff]  ;;  %v355_v11 = vld [vmem:[%s793_s11 + $0x8] sm:$0xff] }
   0x9   :  { %519 = vmatprep.subr.bf16.mxu0 %v561_v0  ;;  %v236_v53 = vpack.c.bf16 %v235_v51, %v234_v50  ;;  %v284_v54 = vld [vmem:[%s791_s8] sm:$0xff]  ;;  %v411_v9 = vpack.c.bf16 %v408_v8, %v407_v7 }
   0xa   :  { %512 = vmatpush3.bf16.msra.mxu1 %v120_v12  ;;  %v289_v56 = vpack.c.bf16 %v285_v55, %v284_v54  ;;  %v405_v4 = vld [vmem:[%s792_s10] sm:$0xff]  ;;  %v356_v12 = vld [vmem:[%s793_s11 + $0x10] sm:$0xff] }
   0xb   :  { %525 = vmatprep.subr.bf16.mxu1 %v561_v0  ;;  %v410_v6 = vpack.c.bf16 %v406_v5, %v405_v4  ;;  %v354_v10 = vld [vmem:[%s793_s11] sm:$0xff] }
   0xc   :  { %520 = vmatpush3.bf16.msra.mxu0 %v180_v30 }
   0xd   :  { %531 = vmatprep.subr.bf16.mxu0 %v561_v0 }
  0xda   :  { %v98_v14 = vpop.f32.mrb[0].mxu0 }
  0xdb   :  { %v99_v15 = vadd.f32 %v471_v13, %v98_v14  ;;  %v507_v16 = vpop.f32.mrb[1].mxu0  ;;  %v357_v14 = vld [vmem:[%s793_s11 + $0x18] sm:$0xff] }
  0xdc   :  { %v101_v17 = vpop.f32.mrb[2].mxu0  ;;  %v480_v16 = vld [vmem:[%s794_s9] ss:$0 sm:$0xff] }
  0xdd   :  { %v105_v18 = vmax.f32 %v99_v15, 0.0  ;;  %v102_v19 = vadd.f32 %v471_v13, %v101_v17  ;;  %v508_v20 = vpop.f32.mrb[3].mxu0  ;;  %v359_v13 = vpack.c.bf16 %v355_v11, %v354_v10  ;;  %v360_v15 = vpack.c.bf16 %v357_v14, %v356_v12 }
  0xdf   :  { %108 = vst.msk [vmem:[%s786_s13] sm:$0xff] %vm107_vm2, %v105_v18  ;;  %v106_v21 = vmax.f32 %v102_v19, 0.0  ;;  %v473_v22 = vclamps-f32 %v105_v18, 10.0 }
  0xe1   :  { %109 = vst.msk [vmem:[%s786_s13 + $0x8] sm:$0xff] %vm107_vm2, %v106_v21  ;;  %v474_v23 = vclamps-f32 %v106_v21, 10.0 }
  0xe3   :  { %v118_v24 = vpack.c.bf16 %v474_v23, %v473_v22 }
  0xe5   :  { %514 = vmatmul.mubr.msk.bf16.vlgmr.msra.gmra.mrb[0].mxu1 %vm107_vm2, %v118_v24 }
  0xe6   :  { %527 = vmatprep.mubr.msk.bf16.mxu1 %vm562_vm0, %v561_v0 }
 0x1b8   :  { %v165_v32 = vpop.f32.mrb[0].mxu1 }
 0x1b9   :  { %v166_v33 = vadd.f32 %v475_v31, %v165_v32  ;;  %v515_v34 = vpop.f32.mrb[1].mxu1 }
 0x1ba   :  { %v168_v35 = vpop.f32.mrb[2].mxu1 }
 0x1bb   :  { %v169_v36 = vadd.f32 %v475_v31, %v168_v35  ;;  %v516_v37 = vpop.f32.mrb[3].mxu1  ;;  %v172_v38 = vmax.f32 %v166_v33, 0.0 }
 0x1bd   :  { %v173_v39 = vmax.f32 %v169_v36, 0.0 }
 0x1bf   :  { %v178_v40 = vpack.c.bf16 %v173_v39, %v172_v38 }
 0x1c1   :  { %522 = vmatmul.mubr.msk.bf16.vlgmr.msra.gmra.mrb[4].mxu0 %vm107_vm2, %v178_v40  ;;  %v413_v40 = vlaneseq }
 0x1c2   :  { %535 = vmatprep.mubr.msk.bf16.mxu0 %vm562_vm0, %v561_v0  ;;  %532 = vmatpush3.bf16.msra.mxu0 %v289_v56 }
 0x1c3   :  { %533 = vmatprep.subr.bf16.mxu0 %v561_v0 }
 0x1c6   :  { %534 = vmatpush3.bf16.msra.mxu0 %v290_v59 }
 0x1c7   :  { %547 = vmatprep.subr.bf16.mxu0 %v561_v0 }
 0x294   :  { %v225_v42 = vpop.f32.mrb[4].mxu0 }
 0x295   :  { %v226_v43 = vadd.f32 %v477_v41, %v225_v42  ;;  %v523_v44 = vpop.f32.mrb[5].mxu0  ;;  %v361_v42 = vld [vmem:[%s795_s12] sm:$0x1] }
 0x296   :  { %v228_v45 = vpop.f32.mrb[6].mxu0 }
 0x297   :  { %v229_v46 = vadd.f32 %v477_v41, %v228_v45  ;;  %v524_v47 = vpop.f32.mrb[7].mxu0  ;;  %v232_v48 = vmax.f32 %v226_v43, 0.0  ;;  %v414_v41 = vshrl.u32 %v413_v40, 7 }
 0x299   :  { %v233_v49 = vmax.f32 %v229_v46, 0.0  ;;  %v415_v45 = vsub.s32 0, %v414_v41 }
 0x29b   :  { %v237_v52 = vpack.c.bf16 %v233_v49, %v232_v48 }
 0x29d   :  { %526 = vmatpush3.bf16.msra.mxu1 %v237_v52 }
 0x29e   :  { %539 = vmatprep.subr.bf16.mxu1 %v561_v0 }
 0x2a0   :  { %528 = vmatmul.mubr.msk.bf16.vlgmr.msra.gmra.mrb[4].mxu1 %vm60_vm1, %v236_v53 }
 0x2a1   :  { %543 = vmatprep.mubr.msk.bf16.mxu1 %vm562_vm0, %v561_v0  ;;  %540 = vmatpush3.bf16.msra.mxu1 %v359_v13 }
 0x2a2   :  { %541 = vmatprep.subr.bf16.mxu1 %v561_v0 }
 0x2a5   :  { %542 = vmatpush3.bf16.msra.mxu1 %v360_v15 }
 0x373   :  { %v275_v60 = vpop.f32.mrb[4].mxu1 }
 0x374   :  { %v529_v61 = vpop.f32.mrb[5].mxu1  ;;  %v282_v63 = vadd.f32 %v275_v60, %v172_v38 }
 0x375   :  { %v278_v62 = vpop.f32.mrb[6].mxu1 }
 0x376   :  { %v283_v1 = vadd.f32 %v278_v62, %v173_v39  ;;  %v530_v2 = vpop.f32.mrb[7].mxu1 }
 0x378   :  { %v288_v3 = vpack.c.bf16 %v283_v1, %v282_v63 }
 0x37a   :  { %536 = vmatmul.mubr.msk.bf16.vlgmr.msra.gmra.mrb[8].mxu0 %vm107_vm2, %v288_v3 }
 0x37b   :  { %551 = vmatprep.mubr.msk.bf16.mxu0 %vm562_vm0, %v561_v0  ;;  %548 = vmatpush3.bf16.msra.mxu0 %v410_v6 }
 0x37c   :  { %549 = vmatprep.subr.bf16.mxu0 %v561_v0 }
 0x37f   :  { %550 = vmatpush3.bf16.msra.mxu0 %v411_v9 }
 0x44d   :  { %v335_v17 = vpop.f32.mrb[8].mxu0 }
 0x44e   :  { %v336_v18 = vadd.f32 %v480_v16, %v335_v17  ;;  %v537_v19 = vpop.f32.mrb[9].mxu0 }
 0x44f   :  { %v338_v20 = vpop.f32.mrb[10].mxu0 }
 0x450   :  { %557 = vtanh.f32 %v336_v18  ;;  %v339_v21 = vadd.f32 %v480_v16, %v338_v20  ;;  %v538_v22 = vpop.f32.mrb[11].mxu0 }
 0x452   :  { %559 = vtanh.f32 %v339_v21 }
 0x45a   :  { %v558_v23 = vpop.eup %557 }
 0x45b   :  { %v344_v25 = vsel %vm107_vm2, %v558_v23, 0.0 }
 0x45c   :  { %v560_v24 = vpop.eup %559 }
 0x45d   :  { %v345_v26 = vsel %vm107_vm2, %v560_v24, 0.0  ;;  %v409_v0 = vpack.c.bf16 %v560_v24, %v558_v23 }
 0x45e   :  { %v346_v27 = vadd.f32 %v345_v26, %v344_v25 }
 0x45f   :  { %552 = vmatmul.mubr.msk.bf16.vlgmr.msra.gmra.mrb[12].mxu0 %vm107_vm2, %v409_v0 }
 0x460   :  { %v347_v28 = vrot.slane %v346_v27, 4 }
 0x462   :  { %v348_v29 = vadd.f32 %v347_v28, %v346_v27 }
 0x464   :  { %v349_v30 = vrot.slane %v348_v29, 2 }
 0x466   :  { %v350_v31 = vadd.f32 %v349_v30, %v348_v29 }
 0x468   :  { %v351_v32 = vrot.slane %v350_v31, 1 }
 0x46a   :  { %v352_v33 = vadd.f32 %v351_v32, %v350_v31 }
 0x46c   :  { %v353_v34 = vmul.f32 0.0625, %v352_v33 }
 0x46e   :  { %v358_v35 = vpack.c.bf16 %v353_v34, %v353_v34 }
 0x470   :  { %544 = vmatmul.mubr.msk.bf16.vlgmr.msra.gmra.mrb[8].mxu1 %vm107_vm2, %v358_v35 }
 0x532   :  { %v454_v36 = vpop.f32.mrb[12].mxu0 }
 0x533   :  { %v553_v37 = vpop.f32.mrb[13].mxu0 }
 0x534   :  { %v457_v38 = vpop.f32.mrb[14].mxu0 }
 0x535   :  { %v554_v39 = vpop.f32.mrb[15].mxu0 }
 0x543   :  { %v399_v43 = vpop.f32.mrb[8].mxu1 }
 0x544   :  { %v400_v44 = vadd.f32 %v399_v43, %v361_v42  ;;  %v545_v46 = vpop.f32.mrb[9].mxu1 }
 0x545   :  { %v402_v47 = vpop.f32.mrb[10].mxu1 }
 0x546   :  { %v412_v48 = vmul.f32 0.5, %v400_v44  ;;  %v546_v49 = vpop.f32.mrb[11].mxu1 }
 0x548   :  { %v416_v50 = vrot.slane %v412_v48, %v415_v45 }
 0x54a   :  { %v455_v51 = vadd.f32 %v454_v36, %v416_v50  ;;  %v458_v52 = vadd.f32 %v457_v38, %v416_v50 }
 0x54c   :  { %461 = vst.msk [vmem:[%s796_s14] sm:$0xff] %vm60_vm1, %v455_v51  ;;  %462 = vst.msk [vmem:[%s796_s14 + $0x8] sm:$0xff] %vm60_vm1, %v458_v52 }

// kernel: temporal_mscia_forward.6
= control target key start
LH: loop header
LB: loop body
LE: loop exit
PB: predicated region body
PF: predicated region fallthrough
CT: control target
= control target key end

     0   :  { %s805_s30 = smov 0   ;;  %s901_s0 = inlined_call_operand.vmem [shape: f32[3,16,16], index: 0, kind: input, shape index: {}]   ;;  %s902_s1 = inlined_call_operand.vmem [shape: f32[3,16,32], index: 1, kind: input, shape index: {}]   ;;  %s903_s2 = inlined_call_operand.vmem [shape: f32[16,32], index: 2, kind: input, shape index: {}]   ;;  %s904_s3 = inlined_call_operand.vmem [shape: f32[32,32], index: 3, kind: input, shape index: {}]   ;;  %s905_s4 = inlined_call_operand.vmem [shape: f32[1,32], index: 4, kind: input, shape index: {}]   ;;  %s906_s5 = inlined_call_operand.vmem [shape: f32[32,32], index: 5, kind: input, shape index: {}]   ;;  %s907_s6 = inlined_call_operand.vmem [shape: f32[1,32], index: 6, kind: input, shape index: {}]   ;;  %s908_s7 = inlined_call_operand.vmem [shape: f32[32,32], index: 7, kind: input, shape index: {}]   ;;  %s909_s8 = inlined_call_operand.vmem [shape: f32[1,32], index: 8, kind: input, shape index: {}]   ;;  %s910_s9 = inlined_call_operand.vmem [shape: f32[3,16,32], index: 9, kind: output, shape index: {}]  }
   0x1 LB: > { %s665_s10 = sadd.s32 4294967295, %s751_s30   ;;  %p669_p0 = scmp.ge.s32.totalorder %s751_s30, 1  ;;  %s751_s30 = sphi %s805_s30, %s19_s30  }
   0x2   : > { %p297_p1 = scmp.lt.s32.totalorder %s751_s30, 4 }
   0x4   : > { %p298_p2 = pnand %p669_p0, %p297_p1 }
   0x5   : > { %v360_v0 = vld [vmem:[%s904_s3] sm:$0xff] (!%p298_p2)  ;;  %v361_v1 = vld [vmem:[%s904_s3 + $0x8] sm:$0xff] (!%p298_p2)  ;;  %v362_v2 = vld [vmem:[%s904_s3 + $0x10] sm:$0xff] (!%p298_p2)  ;;  %p338_p3 = scmp.lt.s32.totalorder (!%p298_p2), %s665_s10, 2  ;;  %v753_v3 = vmov (!%p298_p2), 0.0   ;;  %vm754_vm0 = vmmov (!%p298_p2), 0  }
   0x6   : > { %301 = sbr.rel (%p298_p2) target bundleno = 912 (0x390), region = 56  ;;  %701 = vmatprep.subr.bf16.mxu0 (!%p298_p2), %v753_v3  ;;  %v365_v4 = vpack.c.bf16 (!%p298_p2), %v361_v1, %v360_v0  ;;  %v363_v5 = vld [vmem:[%s904_s3 + $0x18] sm:$0xff] (!%p298_p2)  ;;  %705 = vmatprep.mubr.msk.bf16.mxu0 (!%p298_p2), %vm754_vm0, %v753_v3  ;;  %vm374_vm1 = vcmask (!%p298_p2), 261120   ;;  %v425_v12 = vld [vmem:[%s906_s5] sm:$0xff] (!%p298_p2)  ;;  %v426_v13 = vld [vmem:[%s906_s5 + $0x8] sm:$0xff] (!%p298_p2)  ;;  %vm489_vm2 = vcmask (!%p298_p2), 130048  }
   0x7   : > { %709 = vmatprep.subr.bf16.mxu1 (!%p298_p2), %v753_v3  ;;  %713 = vmatprep.mubr.msk.bf16.mxu1 (!%p298_p2), %vm754_vm0, %v753_v3  ;;  %v366_v6 = vpack.c.bf16 (!%p298_p2), %v363_v5, %v362_v2  ;;  %v430_v14 = vpack.c.bf16 (!%p298_p2), %v426_v13, %v425_v12  ;;  %v427_v15 = vld [vmem:[%s906_s5 + $0x10] sm:$0xff] (!%p298_p2)  ;;  %v428_v16 = vld [vmem:[%s906_s5 + $0x18] sm:$0xff] (!%p298_p2)  ;;  %v678_v18 = vld [vmem:[%s905_s4] ss:$0 sm:$0xff] (!%p298_p2) }
   0x8   : > { %702 = vmatpush3.bf16.msra.mxu0 (!%p298_p2), %v365_v4  ;;  %v431_v17 = vpack.c.bf16 (!%p298_p2), %v428_v16, %v427_v15  ;;  %v421_v26 = vld [vmem:[%s903_s2] sm:$0xff] (!%p298_p2)  ;;  %v422_v27 = vld [vmem:[%s903_s2 + $0x8] sm:$0xff] (!%p298_p2)  ;;  %v538_v48 = vld [vmem:[%s908_s7 + $0x10] sm:$0xff] (!%p298_p2) }
   0x9   : > { %703 = vmatprep.subr.bf16.mxu0 (!%p298_p2), %v753_v3  ;;  %710 = vmatpush3.bf16.msra.mxu1 (!%p298_p2), %v430_v14  ;;  %v680_v32 = vld [vmem:[%s907_s6] ss:$0 sm:$0xff] (!%p298_p2)  ;;  %v537_v46 = vld [vmem:[%s908_s7 + $0x8] sm:$0xff] (!%p298_p2)  ;;  %v539_v49 = vld [vmem:[%s908_s7 + $0x18] sm:$0xff] (!%p298_p2) }
   0xa   : > { %711 = vmatprep.subr.bf16.mxu1 (!%p298_p2), %v753_v3  ;;  %v536_v45 = vld [vmem:[%s908_s7] sm:$0xff] (!%p298_p2)  ;;  %v542_v50 = vpack.c.bf16 (!%p298_p2), %v539_v49, %v538_v48 }
   0xb   : > { %v541_v47 = vpack.c.bf16 (!%p298_p2), %v537_v46, %v536_v45  ;;  %v683_v58 = vld [vmem:[%s909_s8] ss:$0 sm:$0xff] (!%p298_p2) }
   0xc   : > { %704 = vmatpush3.bf16.msra.mxu0 (!%p298_p2), %v366_v6 }
   0xd   : > { %s912_s10 = smov (!%p338_p3, %s665_s10), 2  ;;  %717 = vmatprep.subr.bf16.mxu0 %v753_v3  ;;  %712 = vmatpush3.bf16.msra.mxu1 %v431_v17 }
   0xe   : > { %s832_s19 = sshll.u32 %s912_s10, 4  ;;  %723 = vmatprep.subr.bf16.mxu1 %v753_v3 }
   0xf   : > { %s347_s22 = scalar_lea.vmem %s902_s1, %s832_s19  ;;  %s352_s15 = scalar_lea.vmem %s910_s9, %s832_s19 }
  0x10   : > { %v354_v7 = vld [vmem:[%s347_s22] sm:$0xff]  ;;  %v355_v8 = vld [vmem:[%s347_s22 + $0x8] sm:$0xff]  ;;  %s342_s22 = scalar_lea.vmem %s901_s0, %s832_s19 }
  0x11   : > { %v676_v9 = vclamps-f32 %v354_v7, 10.0  ;;  %v677_v10 = vclamps-f32 %v355_v8, 10.0  ;;  %v485_v41 = vld [vmem:[%s342_s22] sm:$0xff]  ;;  %v486_v42 = vld [vmem:[%s342_s22 + $0x8] sm:$0xff] }
  0x12   : > { %v487_v44 = vpack.c.bf16 %v486_v42, %v485_v41 }
  0x13   : > { %v364_v11 = vpack.c.bf16 %v677_v10, %v676_v9 }
  0x15   : > { %706 = vmatmul.mubr.msk.bf16.vlgmr.msra.gmra.mrb[0].mxu0 %vm374_vm1, %v364_v11 }
  0x16   : > { %719 = vmatprep.mubr.msk.bf16.mxu0 %vm754_vm0, %v753_v3 }
  0xe8   : > { %v412_v19 = vpop.f32.mrb[0].mxu0 }
  0xe9   : > { %v413_v20 = vadd.f32 %v678_v18, %v412_v19  ;;  %v707_v21 = vpop.f32.mrb[1].mxu0 }
  0xea   : > { %v415_v22 = vpop.f32.mrb[2].mxu0 }
  0xeb   : > { %v419_v23 = vmax.f32 %v413_v20, 0.0  ;;  %v416_v24 = vadd.f32 %v678_v18, %v415_v22  ;;  %v708_v25 = vpop.f32.mrb[3].mxu0 }
  0xed   : > { %v420_v28 = vmax.f32 %v416_v24, 0.0  ;;  %v423_v29 = vadd.f32 %v421_v26, %v419_v23 }
  0xef   : > { %v424_v30 = vadd.f32 %v422_v27, %v420_v28 }
  0xf1   : > { %v429_v31 = vpack.c.bf16 %v424_v30, %v423_v29 }
  0xf3   : > { %714 = vmatmul.mubr.msk.bf16.vlgmr.msra.gmra.mrb[0].mxu1 %vm374_vm1, %v429_v31 }
  0xf4   : > { %727 = vmatprep.mubr.msk.bf16.mxu1 %vm754_vm0, %v753_v3  ;;  %724 = vmatpush3.bf16.msra.mxu1 %v541_v47 }
  0xf5   : > { %725 = vmatprep.subr.bf16.mxu1 %v753_v3 }
  0xf8   : > { %726 = vmatpush3.bf16.msra.mxu1 %v542_v50 }
 0x1c6   : > { %v476_v33 = vpop.f32.mrb[0].mxu1 }
 0x1c7   : > { %v477_v34 = vadd.f32 %v680_v32, %v476_v33  ;;  %v715_v35 = vpop.f32.mrb[1].mxu1 }
 0x1c8   : > { %v479_v36 = vpop.f32.mrb[2].mxu1 }
 0x1c9   : > { %v480_v37 = vadd.f32 %v680_v32, %v479_v36  ;;  %v716_v38 = vpop.f32.mrb[3].mxu1  ;;  %v483_v39 = vmax.f32 %v477_v34, 0.0 }
 0x1cb   : > { %v484_v40 = vmax.f32 %v480_v37, 0.0 }
 0x1cd   : > { %v488_v43 = vpack.c.bf16 %v484_v40, %v483_v39 }
 0x1cf   : > { %718 = vmatpush3.bf16.msra.mxu0 %v488_v43 }
 0x1d2   : > { %720 = vmatmul.mubr.msk.bf16.vlgmr.msra.gmra.mrb[4].mxu0 %vm489_vm2, %v487_v44 }
 0x2a5   : > { %v527_v51 = vpop.f32.mrb[4].mxu0 }
 0x2a6   : > { %v721_v52 = vpop.f32.mrb[5].mxu0  ;;  %v534_v54 = vadd.f32 %v527_v51, %v423_v29 }
 0x2a7   : > { %v530_v53 = vpop.f32.mrb[6].mxu0 }
 0x2a8   : > { %v535_v55 = vadd.f32 %v530_v53, %v424_v30  ;;  %v722_v56 = vpop.f32.mrb[7].mxu0 }
 0x2aa   : > { %v540_v57 = vpack.c.bf16 %v535_v55, %v534_v54 }
 0x2ac   : > { %728 = vmatmul.mubr.msk.bf16.vlgmr.msra.gmra.mrb[4].mxu1 %vm374_vm1, %v540_v57 }
 0x37f   : > { %v587_v59 = vpop.f32.mrb[4].mxu1 }
 0x380   : > { %v588_v60 = vadd.f32 %v683_v58, %v587_v59  ;;  %v729_v61 = vpop.f32.mrb[5].mxu1 }
 0x381   : > { %v590_v62 = vpop.f32.mrb[6].mxu1 }
 0x382   : > { %741 = vtanh.f32 %v588_v60  ;;  %v591_v63 = vadd.f32 %v683_v58, %v590_v62  ;;  %v730_v0 = vpop.f32.mrb[7].mxu1 }
 0x384   : > { %743 = vtanh.f32 %v591_v63 }
 0x38c   : > { %v742_v1 = vpop.eup %741 }
 0x38d   : > { %596 = vst.msk [vmem:[%s352_s15] sm:$0xff] %vm374_vm1, %v742_v1 }
 0x38e   : > { %v744_v2 = vpop.eup %743 }
 0x38f   : > { %597 = vst.msk [vmem:[%s352_s15 + $0x8] sm:$0xff] %vm374_vm1, %v744_v2 }
 0x390 PF: > { %s19_s30 = sadd.s32 1, %s751_s30  }
 0x391   : > { %p16_p4 = scmp.ge.s32.totalorder %s19_s30, 5  }
 0x393   :  { %18 = sbr.rel (!%p16_p4) target bundleno = 1 (0x1), region = 89 }

// kernel: temporal_mscia_forward.7
= control target key start
LH: loop header
LB: loop body
LE: loop exit
PB: predicated region body
PF: predicated region fallthrough
CT: control target
= control target key end

     0   :  { %v488_v3 = vmov 0.0   ;;  %vm489_vm0 = vmmov 0   ;;  %s701_s0 = inlined_call_operand.vmem [shape: f32[16,32], index: 0, kind: input, shape index: {}]   ;;  %s702_s1 = inlined_call_operand.vmem [shape: f32[16,32], index: 1, kind: input, shape index: {}]   ;;  %s703_s2 = inlined_call_operand.vmem [shape: f32[16,32], index: 2, kind: input, shape index: {}]   ;;  %s704_s3 = inlined_call_operand.vmem [shape: f32[4,16], index: 3, kind: input, shape index: {}]   ;;  %s705_s4 = inlined_call_operand.vmem [shape: f32[4,32], index: 4, kind: input, shape index: {}]   ;;  %s706_s5 = inlined_call_operand.vmem [shape: f32[4,32], index: 5, kind: input, shape index: {}]   ;;  %s707_s6 = inlined_call_operand.vmem [shape: f32[32,32], index: 6, kind: input, shape index: {}]   ;;  %s708_s7 = inlined_call_operand.vmem [shape: f32[1,32], index: 7, kind: input, shape index: {}]   ;;  %s709_s8 = inlined_call_operand.vmem [shape: f32[32,32], index: 8, kind: input, shape index: {}]   ;;  %s710_s9 = inlined_call_operand.vmem [shape: f32[1,32], index: 9, kind: input, shape index: {}]   ;;  %s711_s10 = inlined_call_operand.vmem [shape: f32[32,32], index: 10, kind: input, shape index: {}]   ;;  %s712_s11 = inlined_call_operand.vmem [shape: f32[1,32], index: 11, kind: input, shape index: {}]   ;;  %s713_s12 = inlined_call_operand.vmem [shape: f32[16,32], index: 12, kind: output, shape index: {0}]   ;;  %s714_s13 = inlined_call_operand.hbm [shape: f32[16,32], index: 13, kind: output, shape index: {1}]   ;;  %s715_s14 = inlined_call_operand.vmem [shape: f32[4,32], index: 14, kind: output, shape index: {2}]   ;;  %s716_s15 = inlined_call_operand.vmem [shape: f32[4,32], index: 15, kind: output, shape index: {3}]  }
   0x1   :  { %v53_v0 = vld [vmem:[%s707_s6] sm:$0xff]  ;;  %v54_v1 = vld [vmem:[%s707_s6 + $0x8] sm:$0xff]  ;;  %v55_v2 = vld [vmem:[%s707_s6 + $0x10] sm:$0xff]  ;;  %415 = vmatprep.subr.bf16.mxu0 %v488_v3  ;;  %419 = vmatprep.mubr.msk.bf16.mxu0 %vm489_vm0, %v488_v3 }
   0x2   :  { %v58_v4 = vpack.c.bf16 %v54_v1, %v53_v0  ;;  %v56_v5 = vld [vmem:[%s707_s6 + $0x18] sm:$0xff]  ;;  %v47_v6 = vld [vmem:[%s701_s0] sm:$0xff]  ;;  %v48_v7 = vld [vmem:[%s701_s0 + $0x8] sm:$0xff]  ;;  %423 = vmatprep.subr.bf16.mxu1 %v488_v3  ;;  %427 = vmatprep.mubr.msk.bf16.mxu1 %vm489_vm0, %v488_v3 }
   0x3   :  { %v386_v8 = vclamps-f32 %v47_v6, 10.0  ;;  %v387_v9 = vclamps-f32 %v48_v7, 10.0  ;;  %v59_v10 = vpack.c.bf16 %v56_v5, %v55_v2 }
   0x4   :  { %416 = vmatpush3.bf16.msra.mxu0 %v58_v4 }
   0x5   :  { %21 = vsyncpa [#allocation3], 0  ;;  %417 = vmatprep.subr.bf16.mxu0 %v488_v3  ;;  %v178_v11 = vld [vmem:[%s711_s10] sm:$0xff]  ;;  %v179_v12 = vld [vmem:[%s711_s10 + $0x8] sm:$0xff]  ;;  %v57_v13 = vpack.c.bf16 %v387_v9, %v386_v8  ;;  %vm67_vm1 = vcmask 261120   ;;  %vm258_vm2 = vcmask 130048  }
   0x6   :  { %v183_v14 = vpack.c.bf16 %v179_v12, %v178_v11  ;;  %v114_v15 = vld [vmem:[%s709_s8] sm:$0xff]  ;;  %v115_v16 = vld [vmem:[%s709_s8 + $0x8] sm:$0xff]  ;;  %v180_v17 = vld [vmem:[%s711_s10 + $0x10] sm:$0xff]  ;;  %vm304_vm3 = vcmask 257024  }
   0x7   :  { %v119_v18 = vpack.c.bf16 %v115_v16, %v114_v15  ;;  %v181_v19 = vld [vmem:[%s711_s10 + $0x18] sm:$0xff]  ;;  %v176_v21 = vld [vmem:[%s702_s1] sm:$0xff]  ;;  %v177_v22 = vld [vmem:[%s702_s1 + $0x8] sm:$0xff] }
   0x8   :  { %418 = vmatpush3.bf16.msra.mxu0 %v59_v10  ;;  %v184_v20 = vpack.c.bf16 %v181_v19, %v180_v17  ;;  %v182_v23 = vpack.c.bf16 %v177_v22, %v176_v21  ;;  %v116_v24 = vld [vmem:[%s709_s8 + $0x10] sm:$0xff]  ;;  %v117_v25 = vld [vmem:[%s709_s8 + $0x18] sm:$0xff]  ;;  %v394_v27 = vclamps-f32 %v176_v21, 5.0  ;;  %v395_v28 = vclamps-f32 %v177_v22, 5.0  ;;  %v246_v29 = vld [vmem:[%s703_s2] sm:$0xff] }
   0x9   :  { %431 = vmatprep.subr.bf16.mxu0 %v488_v3  ;;  %424 = vmatpush3.bf16.msra.mxu1 %v119_v18  ;;  %v120_v26 = vpack.c.bf16 %v117_v25, %v116_v24  ;;  %v247_v30 = vld [vmem:[%s703_s2 + $0x8] sm:$0xff]  ;;  %v396_v31 = vclamps-f32 %v246_v29, 5.0  ;;  %v309_v35 = vld [vmem:[%s704_s3] sm:$0xf] }
   0xa   :  { %425 = vmatprep.subr.bf16.mxu1 %v488_v3  ;;  %v397_v32 = vclamps-f32 %v247_v30, 5.0  ;;  %v257_v33 = vpack.c.bf16 %v395_v28, %v394_v27  ;;  %v310_v36 = vpack.c.bf16 %v309_v35, %v309_v35  ;;  %v388_v37 = vld [vmem:[%s708_s7] ss:$0 sm:$0xff] }
   0xb   :  { %420 = vmatmul.mubr.msk.bf16.vlgmr.msra.gmra.mrb[0].mxu0 %vm67_vm1, %v57_v13  ;;  %v255_v47 = vld [vmem:[%s704_s3] sm:$0xf] }
   0xc   :  { %432 = vmatpush3.bf16.msra.mxu0 %v183_v14  ;;  %435 = vmatprep.mubr.msk.bf16.mxu0 %vm489_vm0, %v488_v3  ;;  %v311_v34 = vpack.c.bf16 %v397_v32, %v396_v31  ;;  %v256_v48 = vpack.c.bf16 %v255_v47, %v255_v47  ;;  %v392_v49 = vld [vmem:[%s712_s11] ss:$0 sm:$0xff]  ;;  %s490_s11 = smov [#allocation2]  }
   0xd   :  { %433 = vmatprep.subr.bf16.mxu0 %v488_v3  ;;  %426 = vmatpush3.bf16.msra.mxu1 %v120_v26  ;;  %v306_v60 = vld [vmem:[%s706_s5] sm:$0xf]  ;;  %s365_s24 = sshll.u32 %s490_s11, 4  ;;  %s366_s24 = int_to_ptr.vmem [resolvable:$true] %s365_s24 }
   0xe   :  { %439 = vmatprep.subr.bf16.mxu1 %v488_v3  ;;  %v400_v63 = vclamps-f32 %v306_v60, 5.0  ;;  %s464_s27 = scalar_lea.vmem %s366_s24, 256  ;;  %p469_p1 = scmp.lt.s32.totalorder %s366_s24, %s366_s24 }
   0xf   :  { %p465_p0 = scmp.ne.s32.totalorder %s366_s24, %s464_s27  ;;  %p470_p2 = scmp.lt.s32.totalorder %s464_s27, %s464_s27 }
  0x10   :  { %434 = vmatpush3.bf16.msra.mxu0 %v184_v20 }
  0x11   :  { %445 = vmatprep.subr.bf16.mxu0 %v488_v3  ;;  %p471_p3 = por %p470_p2, %p469_p1 }
  0x13   :  { %436 = vmatmul.mubr.msk.bf16.vlgmr.msra.gmra.mrb[4].mxu0 %vm67_vm1, %v182_v23  ;;  %p472_p4 = pnand %p471_p3, %p465_p0 }
  0x14   :  { %447 = vmatprep.mubr.msk.bf16.mxu0 %vm489_vm0, %v488_v3  ;;  %446 = vmatpush3.bf16.msra.mxu0 %v311_v34 }
  0x1b   :  { %448 = vmatmul.mubr.msk.bf16.vlgmr.msra.gmra.mrb[8].mxu0 %vm258_vm2, %v310_v36 }
  0xde   :  { %v105_v38 = vpop.f32.mrb[0].mxu0 }
  0xdf   :  { %v106_v39 = vadd.f32 %v388_v37, %v105_v38  ;;  %v421_v40 = vpop.f32.mrb[1].mxu0 }
  0xe0   :  { %v108_v41 = vpop.f32.mrb[2].mxu0 }
  0xe1   :  { %v109_v42 = vadd.f32 %v388_v37, %v108_v41  ;;  %v422_v43 = vpop.f32.mrb[3].mxu0  ;;  %v112_v44 = vmax.f32 %v106_v39, 0.0 }
  0xe3   :  { %v113_v45 = vmax.f32 %v109_v42, 0.0 }
  0xe5   :  { %v118_v46 = vpack.c.bf16 %v113_v45, %v112_v44 }
  0xe6   :  { %v229_v50 = vpop.f32.mrb[4].mxu0 }
  0xe7   :  { %428 = vmatmul.mubr.msk.bf16.vlgmr.msra.gmra.mrb[0].mxu1 %vm67_vm1, %v118_v46  ;;  %v230_v51 = vadd.f32 %v392_v49, %v229_v50  ;;  %v437_v52 = vpop.f32.mrb[5].mxu0 }
  0xe8   :  { %440 = vmatpush3.bf16.msra.mxu1 %v257_v33  ;;  %441 = vmatprep.mubr.msk.bf16.mxu1 %vm489_vm0, %v488_v3  ;;  %v232_v53 = vpop.f32.mrb[6].mxu0 }
  0xe9   :  { %456 = vtanh.f32 %v230_v51  ;;  %v233_v54 = vadd.f32 %v392_v49, %v232_v53  ;;  %v438_v55 = vpop.f32.mrb[7].mxu0 }
  0xeb   :  { %458 = vtanh.f32 %v233_v54 }
  0xee   :  { %v349_v56 = vpop.f32.mrb[8].mxu0 }
  0xef   :  { %442 = vmatmul.mubr.msk.bf16.vlgmr.msra.gmra.mrb[4].mxu1 %vm258_vm2, %v256_v48  ;;  %v449_v57 = vpop.f32.mrb[9].mxu0  ;;  %v355_v0 = vmul.f32 0.5, %v349_v56 }
  0xf0   :  { %v352_v59 = vpop.f32.mrb[10].mxu0 }
  0xf1   :  { %v450_v61 = vpop.f32.mrb[11].mxu0  ;;  %v356_v1 = vadd.f32 %v400_v63, %v355_v0 }
  0xf3   :  { %v457_v58 = vpop.eup %456  ;;  %357 = vst.msk [vmem:[%s716_s15] sm:$0xf] %vm304_vm3, %v356_v1 }
  0xf4   :  { %238 = vst.msk [vmem:[#allocation2] sm:$0xff] %vm67_vm1, %v457_v58 }
  0xf5   :  { %v459_v62 = vpop.eup %458 }
  0xf6   :  { %239 = vst.msk [vmem:[#allocation2 + $0x8] sm:$0xff] %vm67_vm1, %v459_v62 }
  0xf7   :  { %475 = shalt.err (!%p472_p4)
}
  0xf8   :  { %s476_s29 = scalar_lea.hbm %s714_s13, 256 }
  0xf9   :  { %p477_p5 = scmp.ne.s32.totalorder %s714_s13, %s476_s29  ;;  %p480_p6 = scmp.lt.u32.totalorder %s476_s29, %s714_s13 }
  0xfb   :  { %p482_p7 = pnand %p480_p6, %p477_p5 }
  0xfd   :  { %485 = shalt.err (!%p482_p7)
}
  0xfe   :  { %s491_s15 = smov 128   ;;  %s492_s16 = smov 8   ;;  %v390_v2 = vld [vmem:[%s710_s9] ss:$0 sm:$0xff] }
  0xff   :  { %371 = dma.vmem_to_hbm [thread:$0]  %s366_s24, 256, %s714_s13, [#allocation3], %s491_s15, %s491_s15, %s492_s16  }
 0x100   :  { %v252_v9 = vld [vmem:[%s705_s4] sm:$0xf] }
 0x101   :  { %v398_v10 = vclamps-f32 %v252_v9, 5.0 }
 0x1ba   :  { %v165_v3 = vpop.f32.mrb[0].mxu1 }
 0x1bb   :  { %v166_v4 = vadd.f32 %v390_v2, %v165_v3  ;;  %v429_v5 = vpop.f32.mrb[1].mxu1 }
 0x1bc   :  { %v168_v6 = vpop.f32.mrb[2].mxu1 }
 0x1bd   :  { %460 = vtanh.f32 %v166_v4  ;;  %v169_v7 = vadd.f32 %v390_v2, %v168_v6  ;;  %v430_v8 = vpop.f32.mrb[3].mxu1 }
 0x1bf   :  { %462 = vtanh.f32 %v169_v7 }
 0x1c2   :  { %v296_v11 = vpop.f32.mrb[4].mxu1 }
 0x1c3   :  { %v302_v12 = vmul.f32 0.5, %v296_v11  ;;  %v443_v13 = vpop.f32.mrb[5].mxu1 }
 0x1c4   :  { %v299_v14 = vpop.f32.mrb[6].mxu1 }
 0x1c5   :  { %v303_v15 = vadd.f32 %v398_v10, %v302_v12  ;;  %v444_v16 = vpop.f32.mrb[7].mxu1 }
 0x1c7   :  { %v461_v17 = vpop.eup %460  ;;  %305 = vst.msk [vmem:[%s715_s14] sm:$0xf] %vm304_vm3, %v303_v15 }
 0x1c8   :  { %174 = vst.msk [vmem:[%s713_s12] sm:$0xff] %vm67_vm1, %v461_v17 }
 0x1c9   :  { %v463_v18 = vpop.eup %462 }
 0x1ca   :  { %175 = vst.msk [vmem:[%s713_s12 + $0x8] sm:$0xff] %vm67_vm1, %v463_v18 }
 0x1cb   :  { %486 = dma.done.wait [#allocation3], 256  }
 0x1cc   :  { %487 = vsyncadd [#allocation3], 4294967040 }
 0x1cd   :  { %385 = vsyncpa [#allocation3], 1 }

</bundles_post_ra>
